<compile_context>
chip_gen: v6e
topology: v6e:2x2x1
jax: 0.10.0
libtpu: 0.0.40
codegen_flags: <defaults>
</compile_context>

<pallas_src>
import math
from functools import partial

import jax
import jax.numpy as jnp
from jax.experimental import pallas as pl
from jax.experimental.pallas import tpu as pltpu


_VMEM_LIMIT = 32 * 1024 * 1024   # explicit scoped-VMEM budget; raise for large H / big chunks
_LANE = 128
_SUBLANE = 8


def _round_up(x, m):
    return (x + m - 1) // m * m


def _choose_tile(n, candidates):
    for c in candidates:
        if n % c == 0:
            return c
    return n


# ----------------------------------------------------------------------------- #
# Pallas kernels
# ----------------------------------------------------------------------------- #
def _proj_kernel(x_ref, w_ref, b_ref, o_ref):
    """Hoisted input projection: (TILE_M, D) @ (D, 4H) + b -> (TILE_M, 4H).

    bf16 MXU inputs, f32 accumulation; output last dim 4H is lane-dense for H >= 32.
    """
    x = x_ref[...].astype(jnp.bfloat16)
    o_ref[...] = jnp.dot(x, w_ref[...], preferred_element_type=jnp.float32) + b_ref[...]


def _lstm_recurrent_kernel(xproj_ref, whh_ref, hseq_ref, h_state, c_state):
    """LSTM recurrence only (input projection already hoisted).

    xproj_ref : (N, T, 4H) f32  pre-projected gate inputs for this time chunk
    whh_ref   : (H, 4H)    bf16 recurrent weights (W_hh^T, PyTorch gate order i,f,g,o)
    hseq_ref  : (N, T, H)  f32  hidden outputs for this chunk (batch-first)
    h_state, c_state : (N, H) f32 VMEM scratch carried across chunks
    """
    @pl.when(pl.program_id(0) == 0)
    def _():
        h_state[...] = jnp.zeros_like(h_state)
        c_state[...] = jnp.zeros_like(c_state)

    T = xproj_ref.shape[1]
    H = h_state.shape[-1]
    whh = whh_ref[...]                      # resident; constant index_map across chunks
    xproj = xproj_ref[...]                  # (N, T, 4H)
    h = h_state[...]
    c = c_state[...]
    # Statically unrolled per-step loop; T is a small static chunk size (<= 32).
    for t in range(T):
        gates = xproj[:, t, :] + jnp.dot(
            h.astype(jnp.bfloat16), whh, preferred_element_type=jnp.float32
        )                                   # (N, 4H) f32
        i_g = jax.nn.sigmoid(gates[:, 0 * H:1 * H])
        f_g = jax.nn.sigmoid(gates[:, 1 * H:2 * H])
        g_g = jnp.tanh(gates[:, 2 * H:3 * H])
        o_g = jax.nn.sigmoid(gates[:, 3 * H:4 * H])
        c = f_g * c + i_g * g_g
        h = o_g * jnp.tanh(c)
        hseq_ref[:, t, :] = h
    h_state[...] = h
    c_state[...] = c


def _mlp_kernel(x_ref, w1_ref, b1_ref, w2_ref, b2_ref, o_ref):
    """Linear(H,H) -> ReLU -> Linear(H, OUT_PAD) on a (TILE_M, H) row tile."""
    h = jnp.dot(x_ref[...].astype(jnp.bfloat16), w1_ref[...],
                preferred_element_type=jnp.float32) + b1_ref[...]
    h = jnp.maximum(h, 0.0)
    o_ref[...] = jnp.dot(h.astype(jnp.bfloat16), w2_ref[...],
                         preferred_element_type=jnp.float32) + b2_ref[...]


# ----------------------------------------------------------------------------- #
# Wrappers
# ----------------------------------------------------------------------------- #
def input_projection_pallas(feats, w_ih_t, b):
    """feats: (M, D) f32 -> (M, 4H) f32.  Row-tiled, 'parallel' grid over M."""
    M, D = feats.shape
    G = w_ih_t.shape[1]
    M_pad = _round_up(M, _SUBLANE)
    if M_pad != M:
        feats = jnp.pad(feats, ((0, M_pad - M), (0, 0)))
    tile_m = _choose_tile(M_pad, (512, 256, 128, 64, 32, 16, 8))
    out = pl.pallas_call(
        _proj_kernel,
        out_shape=jax.ShapeDtypeStruct((M_pad, G), jnp.float32),
        grid=(M_pad // tile_m,),
        in_specs=[
            pl.BlockSpec((tile_m, D), lambda i: (i, 0)),
            pl.BlockSpec((D, G), lambda i: (0, 0)),   # constant weight block
            pl.BlockSpec((1, G), lambda i: (0, 0)),   # fused bias b_ih + b_hh
        ],
        out_specs=pl.BlockSpec((tile_m, G), lambda i: (i, 0)),
        compiler_params=pltpu.CompilerParams(
            dimension_semantics=("parallel",),
            vmem_limit_bytes=_VMEM_LIMIT,
        ),
    )(feats, w_ih_t, b)
    return out[:M]


def lstm_recurrence_pallas(xproj, w_hh_t):
    """xproj: (N, L, 4H) f32 pre-projected gates -> hidden sequence (N, L, H) f32."""
    N, L, G = xproj.shape
    H = w_hh_t.shape[0]
    L_pad = _round_up(L, _SUBLANE)
    if L_pad != L:   # pad time with zero gate-inputs; padded steps are sliced off below
        xproj = jnp.pad(xproj, ((0, 0), (0, L_pad - L), (0, 0)))
    t_chunk = _choose_tile(L_pad, (32, 16, 8))
    hseq = pl.pallas_call(
        _lstm_recurrent_kernel,
        out_shape=jax.ShapeDtypeStruct((N, L_pad, H), jnp.float32),
        grid_spec=pltpu.PrefetchScalarGridSpec(
            num_scalar_prefetch=0,
            grid=(L_pad // t_chunk,),
            in_specs=[
                pl.BlockSpec((N, t_chunk, G), lambda c: (0, c, 0)),   # gate inputs chunk
                pl.BlockSpec((H, G), lambda c: (0, 0)),               # W_hh^T (resident)
            ],
            out_specs=pl.BlockSpec((N, t_chunk, H), lambda c: (0, c, 0)),
            scratch_shapes=[
                pltpu.VMEM((N, H), jnp.float32),   # h carry
                pltpu.VMEM((N, H), jnp.float32),   # c carry
            ],
        ),
        compiler_params=pltpu.CompilerParams(
            dimension_semantics=("arbitrary",),    # sequential recurrence
            vmem_limit_bytes=_VMEM_LIMIT,
        ),
    )(xproj, w_hh_t)
    return hseq[:, :L, :]


def mlp_pallas(feats, w1_t, b1, w2_t_pad, b2_pad):
    """feats: (M, H) -> (M, OUT_PAD) with a lane-dense (128-multiple) output."""
    M, H = feats.shape
    out_pad = w2_t_pad.shape[1]
    M_pad = _round_up(M, _SUBLANE)
    if M_pad != M:
        feats = jnp.pad(feats, ((0, M_pad - M), (0, 0)))
    tile_m = _choose_tile(M_pad, (512, 256, 128, 64, 32, 16, 8))
    out = pl.pallas_call(
        _mlp_kernel,
        out_shape=jax.ShapeDtypeStruct((M_pad, out_pad), jnp.float32),
        grid=(M_pad // tile_m,),
        in_specs=[
            pl.BlockSpec((tile_m, H), lambda i: (i, 0)),
            pl.BlockSpec((H, H), lambda i: (0, 0)),
            pl.BlockSpec((1, H), lambda i: (0, 0)),
            pl.BlockSpec((H, out_pad), lambda i: (0, 0)),
            pl.BlockSpec((1, out_pad), lambda i: (0, 0)),
        ],
        out_specs=pl.BlockSpec((tile_m, out_pad), lambda i: (i, 0)),
        compiler_params=pltpu.CompilerParams(
            dimension_semantics=("parallel",),
            vmem_limit_bytes=_VMEM_LIMIT,
        ),
    )(feats, w1_t, b1, w2_t_pad, b2_pad)
    return out[:M]


def init_params(key, input_size, hidden_size, num_layers, out_size):
    """Mirrors torch.nn.LSTM / Linear shapes & init (uniform +-1/sqrt(H)).

    Weights are stored transposed ((in, 4H), (H, 4H), ...) and cast to bf16 (MXU inputs);
    biases stay f32.  The output Linear is zero-padded to 128 lanes for lane-dense stores.
    """
    params = {"lstm": [], "mlp": {}}
    k = 1.0 / math.sqrt(hidden_size)
    keys = jax.random.split(key, 4 * num_layers + 4)
    ki = 0
    for layer in range(num_layers):
        in_dim = input_size if layer == 0 else hidden_size
        w_ih = jax.random.uniform(keys[ki], (4 * hidden_size, in_dim), jnp.float32, -k, k); ki += 1
        w_hh = jax.random.uniform(keys[ki], (4 * hidden_size, hidden_size), jnp.float32, -k, k); ki += 1
        b_ih = jax.random.uniform(keys[ki], (4 * hidden_size,), jnp.float32, -k, k); ki += 1
        b_hh = jax.random.uniform(keys[ki], (4 * hidden_size,), jnp.float32, -k, k); ki += 1
        params["lstm"].append({
            "w_ih_t": w_ih.T.astype(jnp.bfloat16),             # (in_dim, 4H)
            "w_hh_t": w_hh.T.astype(jnp.bfloat16),             # (H, 4H)
            "b": (b_ih + b_hh).reshape(1, 4 * hidden_size),     # (1, 4H) f32
        })
    out_pad = _round_up(out_size, _LANE)
    w1 = jax.random.uniform(keys[ki], (hidden_size, hidden_size), jnp.float32, -k, k); ki += 1
    b1 = jax.random.uniform(keys[ki], (hidden_size,), jnp.float32, -k, k); ki += 1
    w2 = jax.random.uniform(keys[ki], (out_size, hidden_size), jnp.float32, -k, k); ki += 1
    b2 = jax.random.uniform(keys[ki], (out_size,), jnp.float32, -k, k); ki += 1
    w2_t_pad = jnp.zeros((hidden_size, out_pad), jnp.float32).at[:, :out_size].set(w2.T)
    b2_pad = jnp.zeros((1, out_pad), jnp.float32).at[0, :out_size].set(b2)
    params["mlp"] = {
        "w1_t": w1.T.astype(jnp.bfloat16),                      # (H, H)
        "b1": b1.reshape(1, hidden_size),                        # (1, H) f32
        "w2_t_pad": w2_t_pad.astype(jnp.bfloat16),               # (H, OUT_PAD)
        "b2_pad": b2_pad,                                        # (1, OUT_PAD) f32
    }
    return params


@partial(jax.jit, static_argnames=("out_size",))
def lstm_model_forward(params, x, out_size=1):
    """Equivalent of LSTM_model.forward: x (N, L, input_size) -> (N, L, out_size)."""
    N, L, _ = x.shape
    feats = x.reshape(N * L, -1)                     # batch-first flatten (contiguous, free)
    for layer_p in params["lstm"]:                   # stacked layers (dropout = 0.0)
        # Hoisted input projection: ONE big MXU matmul over all N*L rows.
        xproj = input_projection_pallas(feats, layer_p["w_ih_t"], layer_p["b"])
        H = layer_p["w_hh_t"].shape[0]
        hseq = lstm_recurrence_pallas(xproj.reshape(N, L, 4 * H), layer_p["w_hh_t"])
        feats = hseq.reshape(N * L, H)
    mlp = params["mlp"]
    out_padded = mlp_pallas(feats, mlp["w1_t"], mlp["b1"], mlp["w2_t_pad"], mlp["b2_pad"])
    return out_padded[:, :out_size].reshape(N, L, out_size)


# ----------------------------------------------------------------------------- #
# Pure-JAX reference (same bf16-matmul / f32-state dtype policy as the kernels)
# ----------------------------------------------------------------------------- #
def reference_forward(params, x, out_size=1):
    N, L, _ = x.shape
    feats = x.reshape(N * L, -1)
    for p in params["lstm"]:
        H = p["w_hh_t"].shape[0]
        xproj = jnp.dot(feats.astype(jnp.bfloat16), p["w_ih_t"],
                        preferred_element_type=jnp.float32) + p["b"]
        xproj = xproj.reshape(N, L, 4 * H)

        def step(carry, xp_t, p=p, H=H):
            h, c = carry
            g = xp_t + jnp.dot(h.astype(jnp.bfloat16), p["w_hh_t"],
                               preferred_element_type=jnp.float32)
            i = jax.nn.sigmoid(g[:, 0 * H:1 * H])
            f = jax.nn.sigmoid(g[:, 1 * H:2 * H])
            gg = jnp.tanh(g[:, 2 * H:3 * H])
            o = jax.nn.sigmoid(g[:, 3 * H:4 * H])
            c = f * c + i * gg
            h = o * jnp.tanh(c)
            return (h, c), h

        init = (jnp.zeros((N, H), jnp.float32), jnp.zeros((N, H), jnp.float32))
        _, hseq = jax.lax.scan(step, init, jnp.transpose(xproj, (1, 0, 2)))
        feats = jnp.transpose(hseq, (1, 0, 2)).reshape(N * L, H)
    mlp = params["mlp"]
    h = jnp.maximum(jnp.dot(feats.astype(jnp.bfloat16), mlp["w1_t"],
                            preferred_element_type=jnp.float32) + mlp["b1"], 0.0)
    out = jnp.dot(h.astype(jnp.bfloat16), mlp["w2_t_pad"],
                  preferred_element_type=jnp.float32) + mlp["b2_pad"]
    return out[:, :out_size].reshape(N, L, out_size)


# ----------------------------------------------------------------------------- #
if __name__ == "__main__":
    N, L = 2, 8
    input_size, hidden_size, num_layers, out_size = 16, 32, 2, 1

    key = jax.random.PRNGKey(0)
    pkey, xkey = jax.random.split(key)
    params = init_params(pkey, input_size, hidden_size, num_layers, out_size)
    x = jax.random.normal(xkey, (N, L, input_size), jnp.float32)

    out = lstm_model_forward(params, x, out_size=out_size)
    out = jax.block_until_ready(out)
    assert out.shape == (N, L, out_size), out.shape

    ref = jax.block_until_ready(reference_forward(params, x, out_size=out_size))
    max_err = float(jnp.max(jnp.abs(out - ref)))
    assert jnp.allclose(out, ref, atol=1e-2, rtol=1e-2), max_err

    print("KERNEL_OK")
</pallas_src>

<mosaic_0001>
module attributes {stable_mosaic.version = 11 : i64} {
  func.func @_proj_kernel(%arg0: i32, %arg1: memref<16x16xf32, #tpu.memory_space<vmem>>, %arg2: memref<16x128xbf16, #tpu.memory_space<vmem>>, %arg3: memref<1x128xf32, #tpu.memory_space<vmem>>, %arg4: memref<16x128xf32, #tpu.memory_space<vmem>>) attributes {dimension_semantics = [#tpu.dimension_semantics<parallel>], iteration_bounds = array<i64: 1>, scalar_prefetch = 0 : i64, scratch_operands = 0 : i64, tpu.core_type = #tpu.core_type<tc>, window_params = [{transform_indices = @transform_0, window_bounds = array<i64: 16, 16>}, {pipeline_mode = #tpu.pipeline_mode<synchronous>, transform_indices = @transform_1, window_bounds = array<i64: 16, 128>}, {pipeline_mode = #tpu.pipeline_mode<synchronous>, transform_indices = @transform_2, window_bounds = array<i64: 1, 128>}, {transform_indices = @transform_3, window_bounds = array<i64: 16, 128>}]} {
    %c0 = arith.constant 0 : index
    %c0_0 = arith.constant 0 : index
    %0 = vector.load %arg1[%c0, %c0_0] : memref<16x16xf32, #tpu.memory_space<vmem>>, vector<16x16xf32>
    %1 = arith.truncf %0 : vector<16x16xf32> to vector<16x16xbf16>
    %c0_1 = arith.constant 0 : index
    %c0_2 = arith.constant 0 : index
    %2 = vector.load %arg2[%c0_1, %c0_2] : memref<16x128xbf16, #tpu.memory_space<vmem>>, vector<16x128xbf16>
    %cst = arith.constant dense<0.000000e+00> : vector<16x128xf32>
    %3 = tpu.matmul %1, %2, %cst {dimension_numbers = #tpu.dot_dimension_numbers<[1], [0], [0], [1], [0, 0, 1, 1], [], []>} : vector<16x16xbf16>, vector<16x128xbf16>, vector<16x128xf32> -> vector<16x128xf32>
    %c0_3 = arith.constant 0 : index
    %c0_4 = arith.constant 0 : index
    %4 = vector.load %arg3[%c0_3, %c0_4] : memref<1x128xf32, #tpu.memory_space<vmem>>, vector<1x128xf32>
    %5 = vector.broadcast %4 : vector<1x128xf32> to vector<16x128xf32>
    %6 = arith.addf %3, %5 : vector<16x128xf32>
    %c0_5 = arith.constant 0 : index
    %c0_6 = arith.constant 0 : index
    %7 = vector.load %arg4[%c0_5, %c0_6] : memref<16x128xf32, #tpu.memory_space<vmem>>, vector<16x128xf32>
    tpu.vector_store %arg4[%c0_5, %c0_6], %6 {strides = array<i32>} : memref<16x128xf32, #tpu.memory_space<vmem>>, vector<16x128xf32>,
    return
  }
  func.func @transform_0(%arg0: i32) -> (i32, i32) {
    %c0_i32 = arith.constant 0 : i32
    %c0_i32_0 = arith.constant 0 : i32
    return %arg0, %c0_i32 : i32, i32
  }
  func.func @transform_1(%arg0: i32) -> (i32, i32) {
    %c0_i32 = arith.constant 0 : i32
    %c0_i32_0 = arith.constant 0 : i32
    %c0_i32_1 = arith.constant 0 : i32
    return %c0_i32, %c0_i32_0 : i32, i32
  }
  func.func @transform_2(%arg0: i32) -> (i32, i32) {
    %c0_i32 = arith.constant 0 : i32
    %c0_i32_0 = arith.constant 0 : i32
    %c0_i32_1 = arith.constant 0 : i32
    return %c0_i32, %c0_i32_0 : i32, i32
  }
  func.func @transform_3(%arg0: i32) -> (i32, i32) {
    %c0_i32 = arith.constant 0 : i32
    %c0_i32_0 = arith.constant 0 : i32
    return %arg0, %c0_i32 : i32, i32
  }
}

module attributes {stable_mosaic.version = 11 : i64} {
  func.func @_mlp_kernel(%arg0: i32, %arg1: memref<16x32xf32, #tpu.memory_space<vmem>>, %arg2: memref<32x32xbf16, #tpu.memory_space<vmem>>, %arg3: memref<1x32xf32, #tpu.memory_space<vmem>>, %arg4: memref<32x128xbf16, #tpu.memory_space<vmem>>, %arg5: memref<1x128xf32, #tpu.memory_space<vmem>>, %arg6: memref<16x128xf32, #tpu.memory_space<vmem>>) attributes {dimension_semantics = [#tpu.dimension_semantics<parallel>], iteration_bounds = array<i64: 1>, scalar_prefetch = 0 : i64, scratch_operands = 0 : i64, tpu.core_type = #tpu.core_type<tc>, window_params = [{transform_indices = @transform_0, window_bounds = array<i64: 16, 32>}, {pipeline_mode = #tpu.pipeline_mode<synchronous>, transform_indices = @transform_1, window_bounds = array<i64: 32, 32>}, {pipeline_mode = #tpu.pipeline_mode<synchronous>, transform_indices = @transform_2, window_bounds = array<i64: 1, 32>}, {pipeline_mode = #tpu.pipeline_mode<synchronous>, transform_indices = @transform_3, window_bounds = array<i64: 32, 128>}, {pipeline_mode = #tpu.pipeline_mode<synchronous>, transform_indices = @transform_4, window_bounds = array<i64: 1, 128>}, {transform_indices = @transform_5, window_bounds = array<i64: 16, 128>}]} {
    %c0 = arith.constant 0 : index
    %c0_0 = arith.constant 0 : index
    %0 = vector.load %arg1[%c0, %c0_0] : memref<16x32xf32, #tpu.memory_space<vmem>>, vector<16x32xf32>
    %1 = arith.truncf %0 : vector<16x32xf32> to vector<16x32xbf16>
    %c0_1 = arith.constant 0 : index
    %c0_2 = arith.constant 0 : index
    %2 = vector.load %arg2[%c0_1, %c0_2] : memref<32x32xbf16, #tpu.memory_space<vmem>>, vector<32x32xbf16>
    %cst = arith.constant dense<0.000000e+00> : vector<16x32xf32>
    %3 = tpu.matmul %1, %2, %cst {dimension_numbers = #tpu.dot_dimension_numbers<[1], [0], [0], [1], [0, 0, 1, 1], [], []>} : vector<16x32xbf16>, vector<32x32xbf16>, vector<16x32xf32> -> vector<16x32xf32>
    %c0_3 = arith.constant 0 : index
    %c0_4 = arith.constant 0 : index
    %4 = vector.load %arg3[%c0_3, %c0_4] : memref<1x32xf32, #tpu.memory_space<vmem>>, vector<1x32xf32>
    %5 = vector.broadcast %4 : vector<1x32xf32> to vector<16x32xf32>
    %6 = arith.addf %3, %5 : vector<16x32xf32>
    %cst_5 = arith.constant 0.000000e+00 : f32
    %7 = vector.broadcast %cst_5 : f32 to vector<16x32xf32>
    %8 = arith.maximumf %6, %7 : vector<16x32xf32>
    %9 = arith.truncf %8 : vector<16x32xf32> to vector<16x32xbf16>
    %c0_6 = arith.constant 0 : index
    %c0_7 = arith.constant 0 : index
    %10 = vector.load %arg4[%c0_6, %c0_7] : memref<32x128xbf16, #tpu.memory_space<vmem>>, vector<32x128xbf16>
    %cst_8 = arith.constant dense<0.000000e+00> : vector<16x128xf32>
    %11 = tpu.matmul %9, %10, %cst_8 {dimension_numbers = #tpu.dot_dimension_numbers<[1], [0], [0], [1], [0, 0, 1, 1], [], []>} : vector<16x32xbf16>, vector<32x128xbf16>, vector<16x128xf32> -> vector<16x128xf32>
    %c0_9 = arith.constant 0 : index
    %c0_10 = arith.constant 0 : index
    %12 = vector.load %arg5[%c0_9, %c0_10] : memref<1x128xf32, #tpu.memory_space<vmem>>, vector<1x128xf32>
    %13 = vector.broadcast %12 : vector<1x128xf32> to vector<16x128xf32>
    %14 = arith.addf %11, %13 : vector<16x128xf32>
    %c0_11 = arith.constant 0 : index
    %c0_12 = arith.constant 0 : index
    %15 = vector.load %arg6[%c0_11, %c0_12] : memref<16x128xf32, #tpu.memory_space<vmem>>, vector<16x128xf32>
    tpu.vector_store %arg6[%c0_11, %c0_12], %14 {strides = array<i32>} : memref<16x128xf32, #tpu.memory_space<vmem>>, vector<16x128xf32>,
    return
  }
  func.func @transform_0(%arg0: i32) -> (i32, i32) {
    %c0_i32 = arith.constant 0 : i32
    %c0_i32_0 = arith.constant 0 : i32
    return %arg0, %c0_i32 : i32, i32
  }
  func.func @transform_1(%arg0: i32) -> (i32, i32) {
    %c0_i32 = arith.constant 0 : i32
    %c0_i32_0 = arith.constant 0 : i32
    %c0_i32_1 = arith.constant 0 : i32
    return %c0_i32, %c0_i32_0 : i32, i32
  }
  func.func @transform_2(%arg0: i32) -> (i32, i32) {
    %c0_i32 = arith.constant 0 : i32
    %c0_i32_0 = arith.constant 0 : i32
    %c0_i32_1 = arith.constant 0 : i32
    return %c0_i32, %c0_i32_0 : i32, i32
  }
  func.func @transform_3(%arg0: i32) -> (i32, i32) {
    %c0_i32 = arith.constant 0 : i32
    %c0_i32_0 = arith.constant 0 : i32
    %c0_i32_1 = arith.constant 0 : i32
    return %c0_i32, %c0_i32_0 : i32, i32
  }
  func.func @transform_4(%arg0: i32) -> (i32, i32) {
    %c0_i32 = arith.constant 0 : i32
    %c0_i32_0 = arith.constant 0 : i32
    %c0_i32_1 = arith.constant 0 : i32
    return %c0_i32, %c0_i32_0 : i32, i32
  }
  func.func @transform_5(%arg0: i32) -> (i32, i32) {
    %c0_i32 = arith.constant 0 : i32
    %c0_i32_0 = arith.constant 0 : i32
    return %arg0, %c0_i32 : i32, i32
  }
}

module attributes {stable_mosaic.version = 11 : i64} {
  func.func @_proj_kernel(%arg0: i32, %arg1: memref<16x32xf32, #tpu.memory_space<vmem>>, %arg2: memref<32x128xbf16, #tpu.memory_space<vmem>>, %arg3: memref<1x128xf32, #tpu.memory_space<vmem>>, %arg4: memref<16x128xf32, #tpu.memory_space<vmem>>) attributes {dimension_semantics = [#tpu.dimension_semantics<parallel>], iteration_bounds = array<i64: 1>, scalar_prefetch = 0 : i64, scratch_operands = 0 : i64, tpu.core_type = #tpu.core_type<tc>, window_params = [{transform_indices = @transform_0, window_bounds = array<i64: 16, 32>}, {pipeline_mode = #tpu.pipeline_mode<synchronous>, transform_indices = @transform_1, window_bounds = array<i64: 32, 128>}, {pipeline_mode = #tpu.pipeline_mode<synchronous>, transform_indices = @transform_2, window_bounds = array<i64: 1, 128>}, {transform_indices = @transform_3, window_bounds = array<i64: 16, 128>}]} {
    %c0 = arith.constant 0 : index
    %c0_0 = arith.constant 0 : index
    %0 = vector.load %arg1[%c0, %c0_0] : memref<16x32xf32, #tpu.memory_space<vmem>>, vector<16x32xf32>
    %1 = arith.truncf %0 : vector<16x32xf32> to vector<16x32xbf16>
    %c0_1 = arith.constant 0 : index
    %c0_2 = arith.constant 0 : index
    %2 = vector.load %arg2[%c0_1, %c0_2] : memref<32x128xbf16, #tpu.memory_space<vmem>>, vector<32x128xbf16>
    %cst = arith.constant dense<0.000000e+00> : vector<16x128xf32>
    %3 = tpu.matmul %1, %2, %cst {dimension_numbers = #tpu.dot_dimension_numbers<[1], [0], [0], [1], [0, 0, 1, 1], [], []>} : vector<16x32xbf16>, vector<32x128xbf16>, vector<16x128xf32> -> vector<16x128xf32>
    %c0_3 = arith.constant 0 : index
    %c0_4 = arith.constant 0 : index
    %4 = vector.load %arg3[%c0_3, %c0_4] : memref<1x128xf32, #tpu.memory_space<vmem>>, vector<1x128xf32>
    %5 = vector.broadcast %4 : vector<1x128xf32> to vector<16x128xf32>
    %6 = arith.addf %3, %5 : vector<16x128xf32>
    %c0_5 = arith.constant 0 : index
    %c0_6 = arith.constant 0 : index
    %7 = vector.load %arg4[%c0_5, %c0_6] : memref<16x128xf32, #tpu.memory_space<vmem>>, vector<16x128xf32>
    tpu.vector_store %arg4[%c0_5, %c0_6], %6 {strides = array<i32>} : memref<16x128xf32, #tpu.memory_space<vmem>>, vector<16x128xf32>,
    return
  }
  func.func @transform_0(%arg0: i32) -> (i32, i32) {
    %c0_i32 = arith.constant 0 : i32
    %c0_i32_0 = arith.constant 0 : i32
    return %arg0, %c0_i32 : i32, i32
  }
  func.func @transform_1(%arg0: i32) -> (i32, i32) {
    %c0_i32 = arith.constant 0 : i32
    %c0_i32_0 = arith.constant 0 : i32
    %c0_i32_1 = arith.constant 0 : i32
    return %c0_i32, %c0_i32_0 : i32, i32
  }
  func.func @transform_2(%arg0: i32) -> (i32, i32) {
    %c0_i32 = arith.constant 0 : i32
    %c0_i32_0 = arith.constant 0 : i32
    %c0_i32_1 = arith.constant 0 : i32
    return %c0_i32, %c0_i32_0 : i32, i32
  }
  func.func @transform_3(%arg0: i32) -> (i32, i32) {
    %c0_i32 = arith.constant 0 : i32
    %c0_i32_0 = arith.constant 0 : i32
    return %arg0, %c0_i32 : i32, i32
  }
}

module attributes {stable_mosaic.version = 11 : i64} {
  func.func @_lstm_recurrent_kernel(%arg0: i32, %arg1: memref<2x8x128xf32, #tpu.memory_space<vmem>>, %arg2: memref<32x128xbf16, #tpu.memory_space<vmem>>, %arg3: memref<2x8x32xf32, #tpu.memory_space<vmem>>, %arg4: memref<2x32xf32, #tpu.memory_space<vmem>>, %arg5: memref<2x32xf32, #tpu.memory_space<vmem>>) attributes {dimension_semantics = [#tpu.dimension_semantics<arbitrary>], iteration_bounds = array<i64: 1>, scalar_prefetch = 0 : i64, scratch_operands = 2 : i64, tpu.core_type = #tpu.core_type<tc>, window_params = [{transform_indices = @transform_0, window_bounds = array<i64: 2, 8, 128>}, {pipeline_mode = #tpu.pipeline_mode<synchronous>, transform_indices = @transform_1, window_bounds = array<i64: 32, 128>}, {transform_indices = @transform_2, window_bounds = array<i64: 2, 8, 32>}]} {
    %c0_i32 = arith.constant 0 : i32
    %0 = arith.cmpi eq, %arg0, %c0_i32 : i32
    %1 = arith.extui %0 : i1 to i32
    %c0_i32_0 = arith.constant 0 : i32
    %2 = arith.cmpi ne, %1, %c0_i32_0 : i32
    scf.if %2 {
      %cst_61 = arith.constant 0.000000e+00 : f32
      %273 = vector.broadcast %cst_61 : f32 to vector<2x32xf32>
      %c0_62 = arith.constant 0 : index
      %c0_63 = arith.constant 0 : index
      %274 = vector.load %arg4[%c0_62, %c0_63] : memref<2x32xf32, #tpu.memory_space<vmem>>, vector<2x32xf32>
      tpu.vector_store %arg4[%c0_62, %c0_63], %273 {strides = array<i32>} : memref<2x32xf32, #tpu.memory_space<vmem>>, vector<2x32xf32>,
      %cst_64 = arith.constant 0.000000e+00 : f32
      %275 = vector.broadcast %cst_64 : f32 to vector<2x32xf32>
      %c0_65 = arith.constant 0 : index
      %c0_66 = arith.constant 0 : index
      %276 = vector.load %arg5[%c0_65, %c0_66] : memref<2x32xf32, #tpu.memory_space<vmem>>, vector<2x32xf32>
      tpu.vector_store %arg5[%c0_65, %c0_66], %275 {strides = array<i32>} : memref<2x32xf32, #tpu.memory_space<vmem>>, vector<2x32xf32>,
    } else {
    }
    %c0 = arith.constant 0 : index
    %c0_1 = arith.constant 0 : index
    %3 = vector.load %arg2[%c0, %c0_1] : memref<32x128xbf16, #tpu.memory_space<vmem>>, vector<32x128xbf16>
    %c0_2 = arith.constant 0 : index
    %c0_3 = arith.constant 0 : index
    %c0_4 = arith.constant 0 : index
    %4 = vector.load %arg1[%c0_2, %c0_3, %c0_4] : memref<2x8x128xf32, #tpu.memory_space<vmem>>, vector<2x8x128xf32>
    %c0_5 = arith.constant 0 : index
    %c0_6 = arith.constant 0 : index
    %5 = vector.load %arg4[%c0_5, %c0_6] : memref<2x32xf32, #tpu.memory_space<vmem>>, vector<2x32xf32>
    %c0_7 = arith.constant 0 : index
    %c0_8 = arith.constant 0 : index
    %6 = vector.load %arg5[%c0_7, %c0_8] : memref<2x32xf32, #tpu.memory_space<vmem>>, vector<2x32xf32>
    %7 = vector.extract_strided_slice %4 {offsets = [0, 0, 0], sizes = [2, 1, 128], strides = [1, 1, 1]} : vector<2x8x128xf32> to vector<2x1x128xf32>
    %8 = vector.shape_cast %7 : vector<2x1x128xf32> to vector<2x128xf32>
    %9 = arith.truncf %5 : vector<2x32xf32> to vector<2x32xbf16>
    %cst = arith.constant dense<0.000000e+00> : vector<2x128xf32>
    %10 = tpu.matmul %9, %3, %cst {dimension_numbers = #tpu.dot_dimension_numbers<[1], [0], [0], [1], [0, 0, 1, 1], [], []>} : vector<2x32xbf16>, vector<32x128xbf16>, vector<2x128xf32> -> vector<2x128xf32>
    %11 = arith.addf %8, %10 : vector<2x128xf32>
    %12 = vector.extract_strided_slice %11 {offsets = [0, 0], sizes = [2, 32], strides = [1, 1]} : vector<2x128xf32> to vector<2x32xf32>
    %13 = arith.negf %12 : vector<2x32xf32>
    %14 = math.exp %13 : vector<2x32xf32>
    %cst_9 = arith.constant 1.000000e+00 : f32
    %15 = vector.broadcast %cst_9 : f32 to vector<2x32xf32>
    %16 = arith.addf %15, %14 : vector<2x32xf32>
    %17 = arith.divf %15, %16 : vector<2x32xf32>
    %18 = vector.extract_strided_slice %11 {offsets = [0, 32], sizes = [2, 32], strides = [1, 1]} : vector<2x128xf32> to vector<2x32xf32>
    %19 = arith.negf %18 : vector<2x32xf32>
    %20 = math.exp %19 : vector<2x32xf32>
    %cst_10 = arith.constant 1.000000e+00 : f32
    %21 = vector.broadcast %cst_10 : f32 to vector<2x32xf32>
    %22 = arith.addf %21, %20 : vector<2x32xf32>
    %23 = arith.divf %21, %22 : vector<2x32xf32>
    %24 = vector.extract_strided_slice %11 {offsets = [0, 64], sizes = [2, 32], strides = [1, 1]} : vector<2x128xf32> to vector<2x32xf32>
    %25 = math.tanh %24 : vector<2x32xf32>
    %26 = vector.extract_strided_slice %11 {offsets = [0, 96], sizes = [2, 32], strides = [1, 1]} : vector<2x128xf32> to vector<2x32xf32>
    %27 = arith.negf %26 : vector<2x32xf32>
    %28 = math.exp %27 : vector<2x32xf32>
    %cst_11 = arith.constant 1.000000e+00 : f32
    %29 = vector.broadcast %cst_11 : f32 to vector<2x32xf32>
    %30 = arith.addf %29, %28 : vector<2x32xf32>
    %31 = arith.divf %29, %30 : vector<2x32xf32>
    %32 = arith.mulf %23, %6 : vector<2x32xf32>
    %33 = arith.mulf %17, %25 : vector<2x32xf32>
    %34 = arith.addf %32, %33 : vector<2x32xf32>
    %35 = math.tanh %34 : vector<2x32xf32>
    %36 = arith.mulf %31, %35 : vector<2x32xf32>
    %c0_12 = arith.constant 0 : index
    %c0_13 = arith.constant 0 : index
    %c0_14 = arith.constant 0 : index
    %37 = vector.load %arg3[%c0_12, %c0_13, %c0_14] : memref<2x8x32xf32, #tpu.memory_space<vmem>>, vector<2x1x32xf32>
    %38 = vector.shape_cast %37 : vector<2x1x32xf32> to vector<2x32xf32>
    %39 = vector.shape_cast %36 : vector<2x32xf32> to vector<2x1x32xf32>
    tpu.vector_store %arg3[%c0_12, %c0_13, %c0_14], %39 {strides = array<i32>} : memref<2x8x32xf32, #tpu.memory_space<vmem>>, vector<2x1x32xf32>,
    %40 = vector.extract_strided_slice %4 {offsets = [0, 1, 0], sizes = [2, 1, 128], strides = [1, 1, 1]} : vector<2x8x128xf32> to vector<2x1x128xf32>
    %41 = vector.shape_cast %40 : vector<2x1x128xf32> to vector<2x128xf32>
    %42 = arith.truncf %36 : vector<2x32xf32> to vector<2x32xbf16>
    %cst_15 = arith.constant dense<0.000000e+00> : vector<2x128xf32>
    %43 = tpu.matmul %42, %3, %cst_15 {dimension_numbers = #tpu.dot_dimension_numbers<[1], [0], [0], [1], [0, 0, 1, 1], [], []>} : vector<2x32xbf16>, vector<32x128xbf16>, vector<2x128xf32> -> vector<2x128xf32>
    %44 = arith.addf %41, %43 : vector<2x128xf32>
    %45 = vector.extract_strided_slice %44 {offsets = [0, 0], sizes = [2, 32], strides = [1, 1]} : vector<2x128xf32> to vector<2x32xf32>
    %46 = arith.negf %45 : vector<2x32xf32>
    %47 = math.exp %46 : vector<2x32xf32>
    %cst_16 = arith.constant 1.000000e+00 : f32
    %48 = vector.broadcast %cst_16 : f32 to vector<2x32xf32>
    %49 = arith.addf %48, %47 : vector<2x32xf32>
    %50 = arith.divf %48, %49 : vector<2x32xf32>
    %51 = vector.extract_strided_slice %44 {offsets = [0, 32], sizes = [2, 32], strides = [1, 1]} : vector<2x128xf32> to vector<2x32xf32>
    %52 = arith.negf %51 : vector<2x32xf32>
    %53 = math.exp %52 : vector<2x32xf32>
    %cst_17 = arith.constant 1.000000e+00 : f32
    %54 = vector.broadcast %cst_17 : f32 to vector<2x32xf32>
    %55 = arith.addf %54, %53 : vector<2x32xf32>
    %56 = arith.divf %54, %55 : vector<2x32xf32>
    %57 = vector.extract_strided_slice %44 {offsets = [0, 64], sizes = [2, 32], strides = [1, 1]} : vector<2x128xf32> to vector<2x32xf32>
    %58 = math.tanh %57 : vector<2x32xf32>
    %59 = vector.extract_strided_slice %44 {offsets = [0, 96], sizes = [2, 32], strides = [1, 1]} : vector<2x128xf32> to vector<2x32xf32>
    %60 = arith.negf %59 : vector<2x32xf32>
    %61 = math.exp %60 : vector<2x32xf32>
    %cst_18 = arith.constant 1.000000e+00 : f32
    %62 = vector.broadcast %cst_18 : f32 to vector<2x32xf32>
    %63 = arith.addf %62, %61 : vector<2x32xf32>
    %64 = arith.divf %62, %63 : vector<2x32xf32>
    %65 = arith.mulf %56, %34 : vector<2x32xf32>
    %66 = arith.mulf %50, %58 : vector<2x32xf32>
    %67 = arith.addf %65, %66 : vector<2x32xf32>
    %68 = math.tanh %67 : vector<2x32xf32>
    %69 = arith.mulf %64, %68 : vector<2x32xf32>
    %c0_19 = arith.constant 0 : index
    %c1 = arith.constant 1 : index
    %c0_20 = arith.constant 0 : index
    %70 = vector.load %arg3[%c0_19, %c1, %c0_20] : memref<2x8x32xf32, #tpu.memory_space<vmem>>, vector<2x1x32xf32>
    %71 = vector.shape_cast %70 : vector<2x1x32xf32> to vector<2x32xf32>
    %72 = vector.shape_cast %69 : vector<2x32xf32> to vector<2x1x32xf32>
    tpu.vector_store %arg3[%c0_19, %c1, %c0_20], %72 {strides = array<i32>} : memref<2x8x32xf32, #tpu.memory_space<vmem>>, vector<2x1x32xf32>,
    %73 = vector.extract_strided_slice %4 {offsets = [0, 2, 0], sizes = [2, 1, 128], strides = [1, 1, 1]} : vector<2x8x128xf32> to vector<2x1x128xf32>
    %74 = vector.shape_cast %73 : vector<2x1x128xf32> to vector<2x128xf32>
    %75 = arith.truncf %69 : vector<2x32xf32> to vector<2x32xbf16>
    %cst_21 = arith.constant dense<0.000000e+00> : vector<2x128xf32>
    %76 = tpu.matmul %75, %3, %cst_21 {dimension_numbers = #tpu.dot_dimension_numbers<[1], [0], [0], [1], [0, 0, 1, 1], [], []>} : vector<2x32xbf16>, vector<32x128xbf16>, vector<2x128xf32> -> vector<2x128xf32>
    %77 = arith.addf %74, %76 : vector<2x128xf32>
    %78 = vector.extract_strided_slice %77 {offsets = [0, 0], sizes = [2, 32], strides = [1, 1]} : vector<2x128xf32> to vector<2x32xf32>
    %79 = arith.negf %78 : vector<2x32xf32>
    %80 = math.exp %79 : vector<2x32xf32>
    %cst_22 = arith.constant 1.000000e+00 : f32
    %81 = vector.broadcast %cst_22 : f32 to vector<2x32xf32>
    %82 = arith.addf %81, %80 : vector<2x32xf32>
    %83 = arith.divf %81, %82 : vector<2x32xf32>
    %84 = vector.extract_strided_slice %77 {offsets = [0, 32], sizes = [2, 32], strides = [1, 1]} : vector<2x128xf32> to vector<2x32xf32>
    %85 = arith.negf %84 : vector<2x32xf32>
    %86 = math.exp %85 : vector<2x32xf32>
    %cst_23 = arith.constant 1.000000e+00 : f32
    %87 = vector.broadcast %cst_23 : f32 to vector<2x32xf32>
    %88 = arith.addf %87, %86 : vector<2x32xf32>
    %89 = arith.divf %87, %88 : vector<2x32xf32>
    %90 = vector.extract_strided_slice %77 {offsets = [0, 64], sizes = [2, 32], strides = [1, 1]} : vector<2x128xf32> to vector<2x32xf32>
    %91 = math.tanh %90 : vector<2x32xf32>
    %92 = vector.extract_strided_slice %77 {offsets = [0, 96], sizes = [2, 32], strides = [1, 1]} : vector<2x128xf32> to vector<2x32xf32>
    %93 = arith.negf %92 : vector<2x32xf32>
    %94 = math.exp %93 : vector<2x32xf32>
    %cst_24 = arith.constant 1.000000e+00 : f32
    %95 = vector.broadcast %cst_24 : f32 to vector<2x32xf32>
    %96 = arith.addf %95, %94 : vector<2x32xf32>
    %97 = arith.divf %95, %96 : vector<2x32xf32>
    %98 = arith.mulf %89, %67 : vector<2x32xf32>
    %99 = arith.mulf %83, %91 : vector<2x32xf32>
    %100 = arith.addf %98, %99 : vector<2x32xf32>
    %101 = math.tanh %100 : vector<2x32xf32>
    %102 = arith.mulf %97, %101 : vector<2x32xf32>
    %c0_25 = arith.constant 0 : index
    %c2 = arith.constant 2 : index
    %c0_26 = arith.constant 0 : index
    %103 = vector.load %arg3[%c0_25, %c2, %c0_26] : memref<2x8x32xf32, #tpu.memory_space<vmem>>, vector<2x1x32xf32>
    %104 = vector.shape_cast %103 : vector<2x1x32xf32> to vector<2x32xf32>
    %105 = vector.shape_cast %102 : vector<2x32xf32> to vector<2x1x32xf32>
    tpu.vector_store %arg3[%c0_25, %c2, %c0_26], %105 {strides = array<i32>} : memref<2x8x32xf32, #tpu.memory_space<vmem>>, vector<2x1x32xf32>,
    %106 = vector.extract_strided_slice %4 {offsets = [0, 3, 0], sizes = [2, 1, 128], strides = [1, 1, 1]} : vector<2x8x128xf32> to vector<2x1x128xf32>
    %107 = vector.shape_cast %106 : vector<2x1x128xf32> to vector<2x128xf32>
    %108 = arith.truncf %102 : vector<2x32xf32> to vector<2x32xbf16>
    %cst_27 = arith.constant dense<0.000000e+00> : vector<2x128xf32>
    %109 = tpu.matmul %108, %3, %cst_27 {dimension_numbers = #tpu.dot_dimension_numbers<[1], [0], [0], [1], [0, 0, 1, 1], [], []>} : vector<2x32xbf16>, vector<32x128xbf16>, vector<2x128xf32> -> vector<2x128xf32>
    %110 = arith.addf %107, %109 : vector<2x128xf32>
    %111 = vector.extract_strided_slice %110 {offsets = [0, 0], sizes = [2, 32], strides = [1, 1]} : vector<2x128xf32> to vector<2x32xf32>
    %112 = arith.negf %111 : vector<2x32xf32>
    %113 = math.exp %112 : vector<2x32xf32>
    %cst_28 = arith.constant 1.000000e+00 : f32
    %114 = vector.broadcast %cst_28 : f32 to vector<2x32xf32>
    %115 = arith.addf %114, %113 : vector<2x32xf32>
    %116 = arith.divf %114, %115 : vector<2x32xf32>
    %117 = vector.extract_strided_slice %110 {offsets = [0, 32], sizes = [2, 32], strides = [1, 1]} : vector<2x128xf32> to vector<2x32xf32>
    %118 = arith.negf %117 : vector<2x32xf32>
    %119 = math.exp %118 : vector<2x32xf32>
    %cst_29 = arith.constant 1.000000e+00 : f32
    %120 = vector.broadcast %cst_29 : f32 to vector<2x32xf32>
    %121 = arith.addf %120, %119 : vector<2x32xf32>
    %122 = arith.divf %120, %121 : vector<2x32xf32>
    %123 = vector.extract_strided_slice %110 {offsets = [0, 64], sizes = [2, 32], strides = [1, 1]} : vector<2x128xf32> to vector<2x32xf32>
    %124 = math.tanh %123 : vector<2x32xf32>
    %125 = vector.extract_strided_slice %110 {offsets = [0, 96], sizes = [2, 32], strides = [1, 1]} : vector<2x128xf32> to vector<2x32xf32>
    %126 = arith.negf %125 : vector<2x32xf32>
    %127 = math.exp %126 : vector<2x32xf32>
    %cst_30 = arith.constant 1.000000e+00 : f32
    %128 = vector.broadcast %cst_30 : f32 to vector<2x32xf32>
    %129 = arith.addf %128, %127 : vector<2x32xf32>
    %130 = arith.divf %128, %129 : vector<2x32xf32>
    %131 = arith.mulf %122, %100 : vector<2x32xf32>
    %132 = arith.mulf %116, %124 : vector<2x32xf32>
    %133 = arith.addf %131, %132 : vector<2x32xf32>
    %134 = math.tanh %133 : vector<2x32xf32>
    %135 = arith.mulf %130, %134 : vector<2x32xf32>
    %c0_31 = arith.constant 0 : index
    %c3 = arith.constant 3 : index
    %c0_32 = arith.constant 0 : index
    %136 = vector.load %arg3[%c0_31, %c3, %c0_32] : memref<2x8x32xf32, #tpu.memory_space<vmem>>, vector<2x1x32xf32>
    %137 = vector.shape_cast %136 : vector<2x1x32xf32> to vector<2x32xf32>
    %138 = vector.shape_cast %135 : vector<2x32xf32> to vector<2x1x32xf32>
    tpu.vector_store %arg3[%c0_31, %c3, %c0_32], %138 {strides = array<i32>} : memref<2x8x32xf32, #tpu.memory_space<vmem>>, vector<2x1x32xf32>,
    %139 = vector.extract_strided_slice %4 {offsets = [0, 4, 0], sizes = [2, 1, 128], strides = [1, 1, 1]} : vector<2x8x128xf32> to vector<2x1x128xf32>
    %140 = vector.shape_cast %139 : vector<2x1x128xf32> to vector<2x128xf32>
    %141 = arith.truncf %135 : vector<2x32xf32> to vector<2x32xbf16>
    %cst_33 = arith.constant dense<0.000000e+00> : vector<2x128xf32>
    %142 = tpu.matmul %141, %3, %cst_33 {dimension_numbers = #tpu.dot_dimension_numbers<[1], [0], [0], [1], [0, 0, 1, 1], [], []>} : vector<2x32xbf16>, vector<32x128xbf16>, vector<2x128xf32> -> vector<2x128xf32>
    %143 = arith.addf %140, %142 : vector<2x128xf32>
    %144 = vector.extract_strided_slice %143 {offsets = [0, 0], sizes = [2, 32], strides = [1, 1]} : vector<2x128xf32> to vector<2x32xf32>
    %145 = arith.negf %144 : vector<2x32xf32>
    %146 = math.exp %145 : vector<2x32xf32>
    %cst_34 = arith.constant 1.000000e+00 : f32
    %147 = vector.broadcast %cst_34 : f32 to vector<2x32xf32>
    %148 = arith.addf %147, %146 : vector<2x32xf32>
    %149 = arith.divf %147, %148 : vector<2x32xf32>
    %150 = vector.extract_strided_slice %143 {offsets = [0, 32], sizes = [2, 32], strides = [1, 1]} : vector<2x128xf32> to vector<2x32xf32>
    %151 = arith.negf %150 : vector<2x32xf32>
    %152 = math.exp %151 : vector<2x32xf32>
    %cst_35 = arith.constant 1.000000e+00 : f32
    %153 = vector.broadcast %cst_35 : f32 to vector<2x32xf32>
    %154 = arith.addf %153, %152 : vector<2x32xf32>
    %155 = arith.divf %153, %154 : vector<2x32xf32>
    %156 = vector.extract_strided_slice %143 {offsets = [0, 64], sizes = [2, 32], strides = [1, 1]} : vector<2x128xf32> to vector<2x32xf32>
    %157 = math.tanh %156 : vector<2x32xf32>
    %158 = vector.extract_strided_slice %143 {offsets = [0, 96], sizes = [2, 32], strides = [1, 1]} : vector<2x128xf32> to vector<2x32xf32>
    %159 = arith.negf %158 : vector<2x32xf32>
    %160 = math.exp %159 : vector<2x32xf32>
    %cst_36 = arith.constant 1.000000e+00 : f32
    %161 = vector.broadcast %cst_36 : f32 to vector<2x32xf32>
    %162 = arith.addf %161, %160 : vector<2x32xf32>
    %163 = arith.divf %161, %162 : vector<2x32xf32>
    %164 = arith.mulf %155, %133 : vector<2x32xf32>
    %165 = arith.mulf %149, %157 : vector<2x32xf32>
    %166 = arith.addf %164, %165 : vector<2x32xf32>
    %167 = math.tanh %166 : vector<2x32xf32>
    %168 = arith.mulf %163, %167 : vector<2x32xf32>
    %c0_37 = arith.constant 0 : index
    %c4 = arith.constant 4 : index
    %c0_38 = arith.constant 0 : index
    %169 = vector.load %arg3[%c0_37, %c4, %c0_38] : memref<2x8x32xf32, #tpu.memory_space<vmem>>, vector<2x1x32xf32>
    %170 = vector.shape_cast %169 : vector<2x1x32xf32> to vector<2x32xf32>
    %171 = vector.shape_cast %168 : vector<2x32xf32> to vector<2x1x32xf32>
    tpu.vector_store %arg3[%c0_37, %c4, %c0_38], %171 {strides = array<i32>} : memref<2x8x32xf32, #tpu.memory_space<vmem>>, vector<2x1x32xf32>,
    %172 = vector.extract_strided_slice %4 {offsets = [0, 5, 0], sizes = [2, 1, 128], strides = [1, 1, 1]} : vector<2x8x128xf32> to vector<2x1x128xf32>
    %173 = vector.shape_cast %172 : vector<2x1x128xf32> to vector<2x128xf32>
    %174 = arith.truncf %168 : vector<2x32xf32> to vector<2x32xbf16>
    %cst_39 = arith.constant dense<0.000000e+00> : vector<2x128xf32>
    %175 = tpu.matmul %174, %3, %cst_39 {dimension_numbers = #tpu.dot_dimension_numbers<[1], [0], [0], [1], [0, 0, 1, 1], [], []>} : vector<2x32xbf16>, vector<32x128xbf16>, vector<2x128xf32> -> vector<2x128xf32>
    %176 = arith.addf %173, %175 : vector<2x128xf32>
    %177 = vector.extract_strided_slice %176 {offsets = [0, 0], sizes = [2, 32], strides = [1, 1]} : vector<2x128xf32> to vector<2x32xf32>
    %178 = arith.negf %177 : vector<2x32xf32>
    %179 = math.exp %178 : vector<2x32xf32>
    %cst_40 = arith.constant 1.000000e+00 : f32
    %180 = vector.broadcast %cst_40 : f32 to vector<2x32xf32>
    %181 = arith.addf %180, %179 : vector<2x32xf32>
    %182 = arith.divf %180, %181 : vector<2x32xf32>
    %183 = vector.extract_strided_slice %176 {offsets = [0, 32], sizes = [2, 32], strides = [1, 1]} : vector<2x128xf32> to vector<2x32xf32>
    %184 = arith.negf %183 : vector<2x32xf32>
    %185 = math.exp %184 : vector<2x32xf32>
    %cst_41 = arith.constant 1.000000e+00 : f32
    %186 = vector.broadcast %cst_41 : f32 to vector<2x32xf32>
    %187 = arith.addf %186, %185 : vector<2x32xf32>
    %188 = arith.divf %186, %187 : vector<2x32xf32>
    %189 = vector.extract_strided_slice %176 {offsets = [0, 64], sizes = [2, 32], strides = [1, 1]} : vector<2x128xf32> to vector<2x32xf32>
    %190 = math.tanh %189 : vector<2x32xf32>
    %191 = vector.extract_strided_slice %176 {offsets = [0, 96], sizes = [2, 32], strides = [1, 1]} : vector<2x128xf32> to vector<2x32xf32>
    %192 = arith.negf %191 : vector<2x32xf32>
    %193 = math.exp %192 : vector<2x32xf32>
    %cst_42 = arith.constant 1.000000e+00 : f32
    %194 = vector.broadcast %cst_42 : f32 to vector<2x32xf32>
    %195 = arith.addf %194, %193 : vector<2x32xf32>
    %196 = arith.divf %194, %195 : vector<2x32xf32>
    %197 = arith.mulf %188, %166 : vector<2x32xf32>
    %198 = arith.mulf %182, %190 : vector<2x32xf32>
    %199 = arith.addf %197, %198 : vector<2x32xf32>
    %200 = math.tanh %199 : vector<2x32xf32>
    %201 = arith.mulf %196, %200 : vector<2x32xf32>
    %c0_43 = arith.constant 0 : index
    %c5 = arith.constant 5 : index
    %c0_44 = arith.constant 0 : index
    %202 = vector.load %arg3[%c0_43, %c5, %c0_44] : memref<2x8x32xf32, #tpu.memory_space<vmem>>, vector<2x1x32xf32>
    %203 = vector.shape_cast %202 : vector<2x1x32xf32> to vector<2x32xf32>
    %204 = vector.shape_cast %201 : vector<2x32xf32> to vector<2x1x32xf32>
    tpu.vector_store %arg3[%c0_43, %c5, %c0_44], %204 {strides = array<i32>} : memref<2x8x32xf32, #tpu.memory_space<vmem>>, vector<2x1x32xf32>,
    %205 = vector.extract_strided_slice %4 {offsets = [0, 6, 0], sizes = [2, 1, 128], strides = [1, 1, 1]} : vector<2x8x128xf32> to vector<2x1x128xf32>
    %206 = vector.shape_cast %205 : vector<2x1x128xf32> to vector<2x128xf32>
    %207 = arith.truncf %201 : vector<2x32xf32> to vector<2x32xbf16>
    %cst_45 = arith.constant dense<0.000000e+00> : vector<2x128xf32>
    %208 = tpu.matmul %207, %3, %cst_45 {dimension_numbers = #tpu.dot_dimension_numbers<[1], [0], [0], [1], [0, 0, 1, 1], [], []>} : vector<2x32xbf16>, vector<32x128xbf16>, vector<2x128xf32> -> vector<2x128xf32>
    %209 = arith.addf %206, %208 : vector<2x128xf32>
    %210 = vector.extract_strided_slice %209 {offsets = [0, 0], sizes = [2, 32], strides = [1, 1]} : vector<2x128xf32> to vector<2x32xf32>
    %211 = arith.negf %210 : vector<2x32xf32>
    %212 = math.exp %211 : vector<2x32xf32>
    %cst_46 = arith.constant 1.000000e+00 : f32
    %213 = vector.broadcast %cst_46 : f32 to vector<2x32xf32>
    %214 = arith.addf %213, %212 : vector<2x32xf32>
    %215 = arith.divf %213, %214 : vector<2x32xf32>
    %216 = vector.extract_strided_slice %209 {offsets = [0, 32], sizes = [2, 32], strides = [1, 1]} : vector<2x128xf32> to vector<2x32xf32>
    %217 = arith.negf %216 : vector<2x32xf32>
    %218 = math.exp %217 : vector<2x32xf32>
    %cst_47 = arith.constant 1.000000e+00 : f32
    %219 = vector.broadcast %cst_47 : f32 to vector<2x32xf32>
    %220 = arith.addf %219, %218 : vector<2x32xf32>
    %221 = arith.divf %219, %220 : vector<2x32xf32>
    %222 = vector.extract_strided_slice %209 {offsets = [0, 64], sizes = [2, 32], strides = [1, 1]} : vector<2x128xf32> to vector<2x32xf32>
    %223 = math.tanh %222 : vector<2x32xf32>
    %224 = vector.extract_strided_slice %209 {offsets = [0, 96], sizes = [2, 32], strides = [1, 1]} : vector<2x128xf32> to vector<2x32xf32>
    %225 = arith.negf %224 : vector<2x32xf32>
    %226 = math.exp %225 : vector<2x32xf32>
    %cst_48 = arith.constant 1.000000e+00 : f32
    %227 = vector.broadcast %cst_48 : f32 to vector<2x32xf32>
    %228 = arith.addf %227, %226 : vector<2x32xf32>
    %229 = arith.divf %227, %228 : vector<2x32xf32>
    %230 = arith.mulf %221, %199 : vector<2x32xf32>
    %231 = arith.mulf %215, %223 : vector<2x32xf32>
    %232 = arith.addf %230, %231 : vector<2x32xf32>
    %233 = math.tanh %232 : vector<2x32xf32>
    %234 = arith.mulf %229, %233 : vector<2x32xf32>
    %c0_49 = arith.constant 0 : index
    %c6 = arith.constant 6 : index
    %c0_50 = arith.constant 0 : index
    %235 = vector.load %arg3[%c0_49, %c6, %c0_50] : memref<2x8x32xf32, #tpu.memory_space<vmem>>, vector<2x1x32xf32>
    %236 = vector.shape_cast %235 : vector<2x1x32xf32> to vector<2x32xf32>
    %237 = vector.shape_cast %234 : vector<2x32xf32> to vector<2x1x32xf32>
    tpu.vector_store %arg3[%c0_49, %c6, %c0_50], %237 {strides = array<i32>} : memref<2x8x32xf32, #tpu.memory_space<vmem>>, vector<2x1x32xf32>,
    %238 = vector.extract_strided_slice %4 {offsets = [0, 7, 0], sizes = [2, 1, 128], strides = [1, 1, 1]} : vector<2x8x128xf32> to vector<2x1x128xf32>
    %239 = vector.shape_cast %238 : vector<2x1x128xf32> to vector<2x128xf32>
    %240 = arith.truncf %234 : vector<2x32xf32> to vector<2x32xbf16>
    %cst_51 = arith.constant dense<0.000000e+00> : vector<2x128xf32>
    %241 = tpu.matmul %240, %3, %cst_51 {dimension_numbers = #tpu.dot_dimension_numbers<[1], [0], [0], [1], [0, 0, 1, 1], [], []>} : vector<2x32xbf16>, vector<32x128xbf16>, vector<2x128xf32> -> vector<2x128xf32>
    %242 = arith.addf %239, %241 : vector<2x128xf32>
    %243 = vector.extract_strided_slice %242 {offsets = [0, 0], sizes = [2, 32], strides = [1, 1]} : vector<2x128xf32> to vector<2x32xf32>
    %244 = arith.negf %243 : vector<2x32xf32>
    %245 = math.exp %244 : vector<2x32xf32>
    %cst_52 = arith.constant 1.000000e+00 : f32
    %246 = vector.broadcast %cst_52 : f32 to vector<2x32xf32>
    %247 = arith.addf %246, %245 : vector<2x32xf32>
    %248 = arith.divf %246, %247 : vector<2x32xf32>
    %249 = vector.extract_strided_slice %242 {offsets = [0, 32], sizes = [2, 32], strides = [1, 1]} : vector<2x128xf32> to vector<2x32xf32>
    %250 = arith.negf %249 : vector<2x32xf32>
    %251 = math.exp %250 : vector<2x32xf32>
    %cst_53 = arith.constant 1.000000e+00 : f32
    %252 = vector.broadcast %cst_53 : f32 to vector<2x32xf32>
    %253 = arith.addf %252, %251 : vector<2x32xf32>
    %254 = arith.divf %252, %253 : vector<2x32xf32>
    %255 = vector.extract_strided_slice %242 {offsets = [0, 64], sizes = [2, 32], strides = [1, 1]} : vector<2x128xf32> to vector<2x32xf32>
    %256 = math.tanh %255 : vector<2x32xf32>
    %257 = vector.extract_strided_slice %242 {offsets = [0, 96], sizes = [2, 32], strides = [1, 1]} : vector<2x128xf32> to vector<2x32xf32>
    %258 = arith.negf %257 : vector<2x32xf32>
    %259 = math.exp %258 : vector<2x32xf32>
    %cst_54 = arith.constant 1.000000e+00 : f32
    %260 = vector.broadcast %cst_54 : f32 to vector<2x32xf32>
    %261 = arith.addf %260, %259 : vector<2x32xf32>
    %262 = arith.divf %260, %261 : vector<2x32xf32>
    %263 = arith.mulf %254, %232 : vector<2x32xf32>
    %264 = arith.mulf %248, %256 : vector<2x32xf32>
    %265 = arith.addf %263, %264 : vector<2x32xf32>
    %266 = math.tanh %265 : vector<2x32xf32>
    %267 = arith.mulf %262, %266 : vector<2x32xf32>
    %c0_55 = arith.constant 0 : index
    %c7 = arith.constant 7 : index
    %c0_56 = arith.constant 0 : index
    %268 = vector.load %arg3[%c0_55, %c7, %c0_56] : memref<2x8x32xf32, #tpu.memory_space<vmem>>, vector<2x1x32xf32>
    %269 = vector.shape_cast %268 : vector<2x1x32xf32> to vector<2x32xf32>
    %270 = vector.shape_cast %267 : vector<2x32xf32> to vector<2x1x32xf32>
    tpu.vector_store %arg3[%c0_55, %c7, %c0_56], %270 {strides = array<i32>} : memref<2x8x32xf32, #tpu.memory_space<vmem>>, vector<2x1x32xf32>,
    %c0_57 = arith.constant 0 : index
    %c0_58 = arith.constant 0 : index
    %271 = vector.load %arg4[%c0_57, %c0_58] : memref<2x32xf32, #tpu.memory_space<vmem>>, vector<2x32xf32>
    tpu.vector_store %arg4[%c0_57, %c0_58], %267 {strides = array<i32>} : memref<2x32xf32, #tpu.memory_space<vmem>>, vector<2x32xf32>,
    %c0_59 = arith.constant 0 : index
    %c0_60 = arith.constant 0 : index
    %272 = vector.load %arg5[%c0_59, %c0_60] : memref<2x32xf32, #tpu.memory_space<vmem>>, vector<2x32xf32>
    tpu.vector_store %arg5[%c0_59, %c0_60], %265 {strides = array<i32>} : memref<2x32xf32, #tpu.memory_space<vmem>>, vector<2x32xf32>,
    return
  }
  func.func @transform_0(%arg0: i32) -> (i32, i32, i32) {
    %c0_i32 = arith.constant 0 : i32
    %c0_i32_0 = arith.constant 0 : i32
    %c0_i32_1 = arith.constant 0 : i32
    return %c0_i32, %arg0, %c0_i32_0 : i32, i32, i32
  }
  func.func @transform_1(%arg0: i32) -> (i32, i32) {
    %c0_i32 = arith.constant 0 : i32
    %c0_i32_0 = arith.constant 0 : i32
    %c0_i32_1 = arith.constant 0 : i32
    return %c0_i32, %c0_i32_0 : i32, i32
  }
  func.func @transform_2(%arg0: i32) -> (i32, i32, i32) {
    %c0_i32 = arith.constant 0 : i32
    %c0_i32_0 = arith.constant 0 : i32
    %c0_i32_1 = arith.constant 0 : i32
    return %c0_i32, %arg0, %c0_i32_0 : i32, i32, i32
  }
}

</mosaic_0001>

<bundles_post_ra>
// kernel: lstm_model_forward.7
= control target key start
LH: loop header
LB: loop body
LE: loop exit
PB: predicated region body
PF: predicated region fallthrough
CT: control target
= control target key end

     0   :  { %v111_v0 = vmov 0.0   ;;  %vm112_vm0 = vmmov 0   ;;  %vm41_vm1 = vcmask 261120   ;;  %s154_s1 = inlined_call_operand.vmem [shape: bf16[32,128], index: 1, kind: input, shape index: {}]   ;;  %s155_s0 = inlined_call_operand.vmem [shape: f32[16,32], index: 0, kind: input, shape index: {}]   ;;  %s156_s2 = inlined_call_operand.vmem [shape: f32[1,128], index: 2, kind: input, shape index: {}]   ;;  %s157_s3 = inlined_call_operand.vmem [shape: f32[16,128], index: 3, kind: output, shape index: {}]  }
   0x1   :  { %99 = vmatprep.subr.bf16.mxu0 %v111_v0  ;;  %v109_v1 = vld [vmem:[%s154_s1 + $0x8] sm:$0xff]   ;;  %103 = vmatprep.mubr.msk.bf16.mxu0 %vm112_vm0, %v111_v0  ;;  %v110_v2 = vld [vmem:[%s154_s1] sm:$0xff]  }
   0x2   :  { %100 = vmatpush3.bf16.msra.mxu0 %v109_v1  ;;  %v15_v3 = vld [vmem:[%s155_s0] sm:$0xff]  ;;  %v16_v4 = vld [vmem:[%s155_s0 + $0x8] sm:$0xff] }
   0x3   :  { %101 = vmatprep.subr.bf16.mxu0 %v111_v0  ;;  %v17_v5 = vpack.c.bf16 %v16_v4, %v15_v3  ;;  %v92_v6 = vld [vmem:[%s156_s2] ss:$0 sm:$0xff] }
   0x6   :  { %102 = vmatpush3.bf16.msra.mxu0 %v110_v2 }
   0x9   :  { %104 = vmatmul.mubr.msk.bf16.vlgmr.msra.gmra.mxu0 %vm41_vm1, %v17_v5 }
  0xc9   :  { %v79_v7 = vpop.f32.mrf.mxu0 }
  0xca   :  { %v80_v8 = vadd.f32 %v92_v6, %v79_v7 }
  0xcb   :  { %v105_v9 = vpop.f32.mrf.mxu0 }
  0xcc   :  { %86 = vst [vmem:[%s157_s3] sm:$0xff] %v80_v8 }
  0xcd   :  { %v82_v10 = vpop.f32.mrf.mxu0 }
  0xce   :  { %v83_v11 = vadd.f32 %v92_v6, %v82_v10 }
  0xcf   :  { %v106_v12 = vpop.f32.mrf.mxu0 }
  0xd0   :  { %87 = vst [vmem:[%s157_s3 + $0x8] sm:$0xff] %v83_v11 }

// kernel: lstm_model_forward.9
= control target key start
LH: loop header
LB: loop body
LE: loop exit
PB: predicated region body
PF: predicated region fallthrough
CT: control target
= control target key end

     0   :  { %v204_v0 = vmov 0.0   ;;  %vm205_vm0 = vmmov 0   ;;  %vm47_vm1 = vcmask 261120   ;;  %s268_s1 = inlined_call_operand.vmem [shape: bf16[32,32], index: 1, kind: input, shape index: {}]   ;;  %s269_s0 = inlined_call_operand.vmem [shape: f32[16,32], index: 0, kind: input, shape index: {}]   ;;  %s270_s3 = inlined_call_operand.vmem [shape: bf16[32,128], index: 3, kind: input, shape index: {}]   ;;  %s271_s2 = inlined_call_operand.vmem [shape: f32[1,32], index: 2, kind: input, shape index: {}]   ;;  %s272_s4 = inlined_call_operand.vmem [shape: f32[1,128], index: 4, kind: input, shape index: {}]   ;;  %s273_s5 = inlined_call_operand.vmem [shape: f32[16,128], index: 5, kind: output, shape index: {}]  }
   0x1   :  { %182 = vmatprep.subr.bf16.mxu0 %v204_v0  ;;  %v200_v1 = vld [vmem:[%s268_s1 + $0x8] sm:$0xff]   ;;  %186 = vmatprep.mubr.msk.bf16.mxu0 %vm205_vm0, %v204_v0  ;;  %v201_v2 = vld [vmem:[%s268_s1] sm:$0xff]  }
   0x2   :  { %190 = vmatprep.subr.bf16.mxu1 %v204_v0  ;;  %194 = vmatprep.mubr.msk.bf16.mxu1 %vm205_vm0, %v204_v0  ;;  %v21_v3 = vld [vmem:[%s269_s0] sm:$0xff]  ;;  %v22_v4 = vld [vmem:[%s269_s0 + $0x8] sm:$0xff] }
   0x3   :  { %183 = vmatpush3.bf16.msra.mxu0 %v200_v1  ;;  %v23_v5 = vpack.c.bf16 %v22_v4, %v21_v3  ;;  %v202_v6 = vld [vmem:[%s270_s3 + $0x8] sm:$0xff]   ;;  %v203_v7 = vld [vmem:[%s270_s3] sm:$0xff]  }
   0x4   :  { %184 = vmatprep.subr.bf16.mxu0 %v204_v0  ;;  %191 = vmatpush3.bf16.msra.mxu1 %v202_v6  ;;  %v168_v8 = vld [vmem:[%s271_s2] ss:$0 sm:$0xff] }
   0x5   :  { %192 = vmatprep.subr.bf16.mxu1 %v204_v0  ;;  %v172_v18 = vld [vmem:[%s272_s4] ss:$0 sm:$0xff] }
   0x7   :  { %185 = vmatpush3.bf16.msra.mxu0 %v201_v2 }
   0x8   :  { %193 = vmatpush3.bf16.msra.mxu1 %v203_v7 }
   0xa   :  { %187 = vmatmul.mubr.msk.bf16.vlgmr.msra.gmra.mxu0 %vm47_vm1, %v23_v5 }
  0xca   :  { %v85_v9 = vpop.f32.mrf.mxu0 }
  0xcb   :  { %v86_v11 = vadd.f32 %v168_v8, %v85_v9 }
  0xcc   :  { %v188_v10 = vpop.f32.mrf.mxu0 }
  0xcd   :  { %v92_v15 = vmax.f32 %v86_v11, 0.0 }
  0xce   :  { %v88_v12 = vpop.f32.mrf.mxu0 }
  0xcf   :  { %v89_v13 = vadd.f32 %v168_v8, %v88_v12 }
  0xd0   :  { %v189_v14 = vpop.f32.mrf.mxu0 }
  0xd1   :  { %v93_v16 = vmax.f32 %v89_v13, 0.0 }
  0xd3   :  { %v94_v17 = vpack.c.bf16 %v93_v16, %v92_v15 }
  0xd5   :  { %195 = vmatmul.mubr.msk.bf16.vlgmr.msra.gmra.mxu1 %vm47_vm1, %v94_v17 }
 0x195   :  { %v155_v19 = vpop.f32.mrf.mxu1 }
 0x196   :  { %v156_v20 = vadd.f32 %v172_v18, %v155_v19 }
 0x197   :  { %v196_v21 = vpop.f32.mrf.mxu1 }
 0x198   :  { %162 = vst [vmem:[%s273_s5] sm:$0xff] %v156_v20 }
 0x199   :  { %v158_v22 = vpop.f32.mrf.mxu1 }
 0x19a   :  { %v159_v23 = vadd.f32 %v172_v18, %v158_v22 }
 0x19b   :  { %v197_v24 = vpop.f32.mrf.mxu1 }
 0x19c   :  { %163 = vst [vmem:[%s273_s5 + $0x8] sm:$0xff] %v159_v23 }

// kernel: lstm_model_forward.5
= control target key start
LH: loop header
LB: loop body
LE: loop exit
PB: predicated region body
PF: predicated region fallthrough
CT: control target
= control target key end

     0   :  { %8 = vsyncpa [#allocation3], 0  ;;  %s138_s12 = smov [#allocation2]   ;;  %s181_s0 = inlined_call_operand.vmem [shape: f32[16,16], index: 0, kind: input, shape index: {}]   ;;  %s182_s1 = inlined_call_operand.hbm [shape: bf16[16,128], index: 1, kind: input, shape index: {}]   ;;  %s183_s2 = inlined_call_operand.vmem [shape: f32[1,128], index: 2, kind: input, shape index: {}]   ;;  %s184_s3 = inlined_call_operand.vmem [shape: f32[16,128], index: 3, kind: output, shape index: {}]  }
   0x1   :  { %s16_s13 = sshll.u32 %s138_s12, 4  ;;  %s17_s13 = int_to_ptr.vmem [resolvable:$true] %s16_s13 }
   0x2   :  { %s124_s14 = scalar_lea.vmem %s17_s13, 128  ;;  %p129_p1 = scmp.lt.s32.totalorder %s17_s13, %s17_s13 }
   0x3   :  { %p125_p0 = scmp.ne.s32.totalorder %s17_s13, %s124_s14  ;;  %p130_p2 = scmp.lt.s32.totalorder %s124_s14, %s124_s14 }
   0x5   :  { %p131_p3 = por %p130_p2, %p129_p1 }
   0x7   :  { %p132_p4 = pnand %p131_p3, %p125_p0 }
   0x9   :  { %135 = shalt.err (!%p132_p4)
}
   0xa   :  { %s139_s15 = smov 64   ;;  %s140_s16 = smov 4  }
   0xb   :  { %22 = dma.hbm_to_vmem [thread:$0]  %s182_s1, 128, %s17_s13, [#allocation3], %s139_s15, %s139_s15, %s140_s16  }
   0xc   :  { %136 = dma.done.wait [#allocation3], 128  }
   0xd   :  { %137 = vsyncadd [#allocation3], 4294967168  ;;  %v141_v0 = vmov 0.0   ;;  %vm142_vm0 = vmmov 0   ;;  %v115_v1 = vld [vmem:[#allocation2] sm:$0xff]   ;;  %v30_v3 = vld [vmem:[%s181_s0 + $0x8] sm:$0xff] }
   0xe   :  { %104 = vmatprep.subr.bf16.mxu0 %v141_v0  ;;  %106 = vmatprep.mubr.msk.bf16.mxu0 %vm142_vm0, %v141_v0  ;;  %v29_v2 = vld [vmem:[%s181_s0] sm:$0xff]  ;;  %vm47_vm1 = vcmask 130048  }
   0xf   :  { %105 = vmatpush3.bf16.msra.mxu0 %v115_v1  ;;  %v31_v4 = vpack.c.bf16 %v30_v3, %v29_v2  ;;  %v99_v5 = vld [vmem:[%s183_s2] ss:$0 sm:$0xff] }
  0x12   :  { %107 = vmatmul.mubr.msk.bf16.vlgmr.msra.gmra.mxu0 %vm47_vm1, %v31_v4 }
  0xd2   :  { %v85_v6 = vpop.f32.mrf.mxu0 }
  0xd3   :  { %v86_v7 = vadd.f32 %v99_v5, %v85_v6 }
  0xd4   :  { %v108_v8 = vpop.f32.mrf.mxu0 }
  0xd5   :  { %92 = vst [vmem:[%s184_s3] sm:$0xff] %v86_v7 }
  0xd6   :  { %v88_v9 = vpop.f32.mrf.mxu0 }
  0xd7   :  { %v89_v10 = vadd.f32 %v99_v5, %v88_v9 }
  0xd8   :  { %v109_v11 = vpop.f32.mrf.mxu0 }
  0xd9   :  { %93 = vst [vmem:[%s184_s3 + $0x8] sm:$0xff] %v89_v10 }
  0xda   :  { %98 = vsyncpa [#allocation3], 1 }

// kernel: lstm_model_forward.6
= control target key start
LH: loop header
LB: loop body
LE: loop exit
PB: predicated region body
PF: predicated region fallthrough
CT: control target
= control target key end

     0   :  { %vm16_vm0 = vcmask 254976   ;;  %v1314_v0 = vmov 0.0   ;;  %vm1315_vm1 = vmmov 0   ;;  %vm40_vm2 = vcmask 261120   ;;  %s1317_s17 = smov 64   ;;  %s1318_s21 = smov 96   ;;  %s1651_s1 = inlined_call_operand.vmem [shape: bf16[32,128], index: 1, kind: input, shape index: {}]   ;;  %s1652_s0 = inlined_call_operand.vmem [shape: f32[2,8,128], index: 0, kind: input, shape index: {}]   ;;  %s1653_s2 = inlined_call_operand.vmem [shape: f32[2,8,32], index: 2, kind: output, shape index: {}]  }
   0x1   :  { %1115 = vmatprep.subr.bf16.mxu0 %v1314_v0  ;;  %v1338_v1 = vld [vmem:[%s1651_s1 + $0x8] sm:$0xff]   ;;  %1119 = vmatprep.mubr.msk.bf16.mxu0 %vm1315_vm1, %v1314_v0  ;;  %17 = vst.msk [vmem:[#allocation2] sm:$0x3] %vm16_vm0, %v1314_v0  ;;  %18 = vst.msk [vmem:[#allocation3] sm:$0x3] %vm16_vm0, %v1314_v0  ;;  %v1351_v2 = vld [vmem:[%s1651_s1] sm:$0xff]  }
   0x2   :  { %1123 = vmatprep.subr.bf16.mxu1 %v1314_v0  ;;  %1127 = vmatprep.mubr.msk.bf16.mxu1 %vm1315_vm1, %v1314_v0  ;;  %s1316_s1 = smov 32   ;;  %v1372_v7 = vld [vmem:[%s1652_s0 + $0x8] sm:$0xff]  ;;  %v1377_v11 = vld [vmem:[%s1652_s0] sm:$0xff]  ;;  %vm164_vm3 = vcmask 1041409   ;;  %vm154_vm4 = vcmask 253952   ;;  %vm280_vm5 = vcmask 254977  }
   0x3   :  { %1116 = vmatpush3.bf16.msra.mxu0 %v1338_v1  ;;  %1124 = vmatpush3.bf16.msra.mxu1 %v1338_v1  ;;  %vm406_vm6 = vcmask 256002   ;;  %vm533_vm7 = vcmask 257027   ;;  %vm660_vm8 = vcmask 258052   ;;  %vm787_vm9 = vcmask 259077  }
   0x4   :  { %1117 = vmatprep.subr.bf16.mxu0 %v1314_v0  ;;  %1125 = vmatprep.subr.bf16.mxu1 %v1314_v0  ;;  %vm914_vm10 = vcmask 260102   ;;  %vm1041_vm11 = vcmask 261127  }
   0x7   :  { %1118 = vmatpush3.bf16.msra.mxu0 %v1351_v2  ;;  %1126 = vmatpush3.bf16.msra.mxu1 %v1351_v2 }
   0x8   :  { %v25_v3 = vld [vmem:[#allocation2] sm:$0x3]  ;;  %v26_v4 = vld [vmem:[#allocation3] sm:$0x3]  ;;  %1131 = vmatprep.subr.bf16.mxu0 %v1314_v0  ;;  %1139 = vmatprep.subr.bf16.mxu1 %v1314_v0 }
   0x9   :  { %v27_v5 = vpack.c.bf16 %v25_v3, %v25_v3  ;;  %v105_v6 = vrot.slane %v26_v4, 1 }
   0xb   :  { %1120 = vmatmul.mubr.msk.bf16.vlgmr.msra.gmra.mxu0 %vm40_vm2, %v27_v5  ;;  %108 = vrot.lane.b32.xlu1 %v105_v6, %s1316_s1 }
   0xc   :  { %1132 = vmatpush3.bf16.msra.mxu0 %v1338_v1  ;;  %1135 = vmatprep.mubr.msk.bf16.mxu0 %vm1315_vm1, %v1314_v0 }
   0xd   :  { %1133 = vmatprep.subr.bf16.mxu0 %v1314_v0 }
   0xf   :  { %106 = vrot.lane.b32.xlu1 %v26_v4, %s1316_s1 }
  0x10   :  { %1134 = vmatpush3.bf16.msra.mxu0 %v1351_v2 }
  0x11   :  { %1147 = vmatprep.subr.bf16.mxu0 %v1314_v0 }
  0x7d   :  { %v109_v30 = vpop.permute.xlu1 %108 }
  0x81   :  { %v107_v32 = vpop.permute.xlu1 %106 }
  0xcb   :  { %v78_v8 = vpop.f32.mrf.mxu0 }
  0xcc   :  { %v85_v9 = vrot.slane %v78_v8, 1  ;;  %v88_v14 = vadd.f32 %v78_v8, %v1377_v11 }
  0xcd   :  { %v1121_v10 = vpop.f32.mrf.mxu0 }
  0xce   :  { %v89_v12 = vadd.f32 %v85_v9, %v1372_v7  ;;  %v1068_v19 = vmul.f32 -1.442695, %v88_v14 }
  0xcf   :  { %v81_v13 = vpop.f32.mrf.mxu0 }
  0xd0   :  { %1186 = vtanh.f32 %v89_v12  ;;  %v1069_v18 = vmul.f32 -1.442695, %v89_v12 }
  0xd1   :  { %v1122_v15 = vpop.f32.mrf.mxu0  ;;  %1188 = vtanh.f32 %v88_v14 }
  0xd2   :  { %1190 = vpow2.f32 %v1069_v18 }
  0xd3   :  { %1192 = vpow2.f32 %v1068_v19 }
  0xdd   :  { %v1187_v16 = vpop.eup %1186 }
  0xde   :  { %118 = vrot.lane.b32.xlu0 %v1187_v16, %s1317_s17  ;;  %v1189_v17 = vpop.eup %1188 }
  0xdf   :  { %v1191_v20 = vpop.eup %1190 }
  0xe0   :  { %v97_v21 = vadd.f32 1.0, %v1191_v20  ;;  %v1193_v22 = vpop.eup %1192 }
  0xe1   :  { %v96_v23 = vadd.f32 1.0, %v1193_v22 }
  0xe2   :  { %116 = vrot.lane.b32.xlu0 %v1189_v17, %s1317_s17  ;;  %1194 = vrcp.f32 %v97_v21 }
  0xe3   :  { %1196 = vrcp.f32 %v96_v23 }
  0xef   :  { %v1195_v24 = vpop.eup %1194 }
  0xf0   :  { %v1197_v27 = vpop.eup %1196  ;;  %v113_v31 = vmul.f32 %v1195_v24, %v109_v30 }
  0xf1   :  { %v112_v35 = vmul.f32 %v1197_v27, %v107_v32 }
 0x150   :  { %v119_v25 = vpop.permute.xlu0 %118 }
 0x151   :  { %v123_v26 = vmul.f32 %v1195_v24, %v119_v25 }
 0x153   :  { %128 = vrot.lane.b32.xlu0 %v123_v26, %s1316_s1 }
 0x154   :  { %v117_v28 = vpop.permute.xlu0 %116 }
 0x155   :  { %v122_v29 = vmul.f32 %v1197_v27, %v117_v28 }
 0x157   :  { %126 = vrot.lane.b32.xlu1 %v122_v29, %s1316_s1 }
 0x1c5   :  { %v129_v33 = vpop.permute.xlu0 %128 }
 0x1c6   :  { %v1385_v34 = vadd.f32 %v129_v33, %v113_v31 }
 0x1c8   :  { %1198 = vtanh.f32 %v1385_v34  ;;  %v235_v14 = vrot.slane %v1385_v34, 7 }
 0x1c9   :  { %v127_v36 = vpop.permute.xlu1 %126 }
 0x1ca   :  { %v1388_v37 = vadd.f32 %v127_v36, %v112_v35 }
 0x1cc   :  { %1200 = vtanh.f32 %v1388_v37  ;;  %v234_v16 = vrot.slane %v1388_v37, 7 }
 0x1d5   :  { %v1199_v38 = vpop.eup %1198 }
 0x1d6   :  { %140 = vrot.lane.b32.xlu0 %v1199_v38, %s1317_s17 }
 0x1d9   :  { %v1201_v39 = vpop.eup %1200 }
 0x1da   :  { %138 = vrot.lane.b32.xlu1 %v1201_v39, %s1317_s17 }
 0x248   :  { %v141_v40 = vpop.permute.xlu0 %140 }
 0x249   :  { %v1393_v41 = vmul.f32 %v1195_v24, %v141_v40 }
 0x24b   :  { %v158_v42 = vpack.c.bf16 %v1393_v41, %v1393_v41 }
 0x24c   :  { %v139_v43 = vpop.permute.xlu1 %138 }
 0x24d   :  { %v162_v44 = vunpack.c.l.b16 %v158_v42  ;;  %v1397_v45 = vmul.f32 %v1197_v27, %v139_v43 }
 0x24f   :  { %v157_v46 = vpack.c.bf16 %v1397_v45, %v1397_v45  ;;  %v163_v47 = vrot.slane %v162_v44, 7 }
 0x251   :  { %v161_v48 = vunpack.c.l.b16 %v157_v46 }
 0x253   :  { %v165_v49 = vsel %vm164_vm3, %v163_v47, %v161_v48 }
 0x254   :  { %v166_v50 = vpack.c.b16 %v165_v49, %v165_v49 }
 0x256   :  { %167 = vrot.lane.b32.xlu0 %v166_v50, %s1316_s1 }
 0x2c8   :  { %v168_v51 = vpop.permute.xlu0 %167 }
 0x2c9   :  { %1128 = vmatmul.mubr.msk.bf16.vlgmr.msra.gmra.mxu1 %vm40_vm2, %v168_v51 }
 0x2ca   :  { %1140 = vmatpush3.bf16.msra.mxu1 %v1338_v1  ;;  %1143 = vmatprep.mubr.msk.bf16.mxu1 %vm1315_vm1, %v1314_v0 }
 0x2cb   :  { %1141 = vmatprep.subr.bf16.mxu1 %v1314_v0 }
 0x2ce   :  { %1142 = vmatpush3.bf16.msra.mxu1 %v1351_v2 }
 0x2cf   :  { %1155 = vmatprep.subr.bf16.mxu1 %v1314_v0 }
 0x389   :  { %v206_v52 = vpop.f32.mrf.mxu1 }
 0x38a   :  { %v213_v53 = vrot.slane %v206_v52, 7  ;;  %v217_v54 = vadd.f32 %v206_v52, %v1372_v7 }
 0x38b   :  { %v1129_v55 = vpop.f32.mrf.mxu1 }
 0x38c   :  { %v216_v56 = vadd.f32 %v213_v53, %v1377_v11  ;;  %1202 = vtanh.f32 %v217_v54  ;;  %v1072_v61 = vmul.f32 -1.442695, %v217_v54 }
 0x38d   :  { %v209_v57 = vpop.f32.mrf.mxu1 }
 0x38e   :  { %1204 = vtanh.f32 %v216_v56  ;;  %v1071_v62 = vmul.f32 -1.442695, %v216_v56 }
 0x38f   :  { %v1130_v58 = vpop.f32.mrf.mxu1  ;;  %1206 = vpow2.f32 %v1072_v61 }
 0x390   :  { %1208 = vpow2.f32 %v1071_v62 }
 0x399   :  { %v1203_v59 = vpop.eup %1202 }
 0x39a   :  { %244 = vrot.lane.b32.xlu0 %v1203_v59, %s1317_s17 }
 0x39b   :  { %v1205_v60 = vpop.eup %1204 }
 0x39c   :  { %242 = vrot.lane.b32.xlu1 %v1205_v60, %s1317_s17  ;;  %v1207_v63 = vpop.eup %1206 }
 0x39d   :  { %v1209_v3 = vpop.eup %1208  ;;  %v225_v4 = vadd.f32 1.0, %v1207_v63 }
 0x39e   :  { %v224_v5 = vadd.f32 1.0, %v1209_v3 }
 0x39f   :  { %1210 = vrcp.f32 %v225_v4 }
 0x3a0   :  { %1212 = vrcp.f32 %v224_v5 }
 0x3ac   :  { %v1211_v6 = vpop.eup %1210 }
 0x3ad   :  { %v1213_v10 = vpop.eup %1212  ;;  %v239_v15 = vmul.f32 %v1211_v6, %v235_v14 }
 0x3ae   :  { %v238_v19 = vmul.f32 %v1213_v10, %v234_v16 }
 0x40c   :  { %v245_v8 = vpop.permute.xlu0 %244 }
 0x40d   :  { %v249_v9 = vmul.f32 %v1211_v6, %v245_v8 }
 0x40e   :  { %v243_v12 = vpop.permute.xlu1 %242 }
 0x40f   :  { %254 = vrot.lane.b32.xlu0 %v249_v9, %s1316_s1  ;;  %v248_v13 = vmul.f32 %v1213_v10, %v243_v12 }
 0x411   :  { %252 = vrot.lane.b32.xlu1 %v248_v13, %s1316_s1 }
 0x481   :  { %v255_v17 = vpop.permute.xlu0 %254 }
 0x482   :  { %v1418_v18 = vadd.f32 %v255_v17, %v239_v15 }
 0x483   :  { %v253_v20 = vpop.permute.xlu1 %252 }
 0x484   :  { %1214 = vtanh.f32 %v1418_v18  ;;  %v258_v21 = vadd.f32 %v253_v20, %v238_v19  ;;  %v361_v61 = vrot.slane %v1418_v18, 7 }
 0x486   :  { %1216 = vtanh.f32 %v258_v21  ;;  %v360_v60 = vrot.slane %v258_v21, 7 }
 0x491   :  { %v1215_v22 = vpop.eup %1214 }
 0x492   :  { %266 = vrot.lane.b32.xlu0 %v1215_v22, %s1317_s17 }
 0x493   :  { %v1217_v23 = vpop.eup %1216 }
 0x494   :  { %264 = vrot.lane.b32.xlu1 %v1217_v23, %s1317_s17 }
 0x504   :  { %v267_v24 = vpop.permute.xlu0 %266 }
 0x505   :  { %v1423_v25 = vmul.f32 %v1211_v6, %v267_v24 }
 0x506   :  { %v265_v26 = vpop.permute.xlu1 %264 }
 0x507   :  { %v1425_v27 = vmul.f32 %v1213_v10, %v265_v26  ;;  %v284_v28 = vpack.c.bf16 %v1423_v25, %v1423_v25 }
 0x509   :  { %v283_v29 = vpack.c.bf16 %v1425_v27, %v1425_v27  ;;  %v288_v31 = vunpack.c.l.b16 %v284_v28 }
 0x50b   :  { %v287_v30 = vunpack.c.l.b16 %v283_v29 }
 0x50d   :  { %v289_v32 = vrot.slane %v287_v30, 1 }
 0x50f   :  { %v290_v33 = vsel %vm164_vm3, %v288_v31, %v289_v32 }
 0x510   :  { %v291_v34 = vpack.c.b16 %v290_v33, %v290_v33 }
 0x512   :  { %292 = vrot.lane.b32.xlu1 %v291_v34, %s1316_s1 }
 0x584   :  { %v293_v35 = vpop.permute.xlu1 %292 }
 0x585   :  { %1136 = vmatmul.mubr.msk.bf16.vlgmr.msra.gmra.mxu0 %vm40_vm2, %v293_v35 }
 0x586   :  { %1148 = vmatpush3.bf16.msra.mxu0 %v1338_v1  ;;  %1151 = vmatprep.mubr.msk.bf16.mxu0 %vm1315_vm1, %v1314_v0 }
 0x587   :  { %1149 = vmatprep.subr.bf16.mxu0 %v1314_v0 }
 0x58a   :  { %1150 = vmatpush3.bf16.msra.mxu0 %v1351_v2 }
 0x58b   :  { %1163 = vmatprep.subr.bf16.mxu0 %v1314_v0 }
 0x645   :  { %v331_v36 = vpop.f32.mrf.mxu0 }
 0x646   :  { %v338_v37 = vrot.slane %v331_v36, 6  ;;  %v339_v38 = vrot.slane %v331_v36, 7 }
 0x647   :  { %v1137_v39 = vpop.f32.mrf.mxu0 }
 0x648   :  { %v342_v40 = vadd.f32 %v338_v37, %v1377_v11  ;;  %v343_v42 = vadd.f32 %v339_v38, %v1372_v7 }
 0x649   :  { %v334_v43 = vpop.f32.mrf.mxu0 }
 0x64a   :  { %1218 = vtanh.f32 %v342_v40  ;;  %v1074_v48 = vmul.f32 -1.442695, %v342_v40  ;;  %v1075_v49 = vmul.f32 -1.442695, %v343_v42 }
 0x64b   :  { %1220 = vtanh.f32 %v343_v42  ;;  %v1138_v44 = vpop.f32.mrf.mxu0 }
 0x64c   :  { %1222 = vpow2.f32 %v1074_v48 }
 0x64d   :  { %1224 = vpow2.f32 %v1075_v49 }
 0x657   :  { %v1219_v46 = vpop.eup %1218 }
 0x658   :  { %v1221_v47 = vpop.eup %1220  ;;  %368 = vrot.lane.b32.xlu0 %v1219_v46, %s1317_s17 }
 0x659   :  { %370 = vrot.lane.b32.xlu1 %v1221_v47, %s1317_s17  ;;  %v1223_v50 = vpop.eup %1222 }
 0x65a   :  { %v1225_v51 = vpop.eup %1224  ;;  %v350_v52 = vadd.f32 1.0, %v1223_v50 }
 0x65b   :  { %v351_v53 = vadd.f32 1.0, %v1225_v51 }
 0x65c   :  { %1226 = vrcp.f32 %v350_v52 }
 0x65d   :  { %1228 = vrcp.f32 %v351_v53 }
 0x669   :  { %v1227_v54 = vpop.eup %1226 }
 0x66a   :  { %v1229_v56 = vpop.eup %1228  ;;  %v364_v62 = vmul.f32 %v1227_v54, %v360_v60 }
 0x66b   :  { %v365_v63 = vmul.f32 %v1229_v56, %v361_v61 }
 0x6ca   :  { %v369_v55 = vpop.permute.xlu0 %368 }
 0x6cb   :  { %v371_v57 = vpop.permute.xlu1 %370  ;;  %v374_v58 = vmul.f32 %v1227_v54, %v369_v55 }
 0x6cc   :  { %v375_v59 = vmul.f32 %v1229_v56, %v371_v57 }
 0x6cd   :  { %378 = vrot.lane.b32.xlu0 %v374_v58, %s1316_s1 }
 0x6ce   :  { %380 = vrot.lane.b32.xlu1 %v375_v59, %s1316_s1 }
 0x73f   :  { %v379_v3 = vpop.permute.xlu0 %378 }
 0x740   :  { %v381_v4 = vpop.permute.xlu1 %380  ;;  %v1447_v5 = vadd.f32 %v379_v3, %v364_v62 }
 0x741   :  { %v1449_v6 = vadd.f32 %v381_v4, %v365_v63 }
 0x742   :  { %1230 = vtanh.f32 %v1447_v5  ;;  %v487_v50 = vrot.slane %v1447_v5, 7 }
 0x743   :  { %1232 = vtanh.f32 %v1449_v6  ;;  %v488_v51 = vrot.slane %v1449_v6, 7 }
 0x74f   :  { %v1231_v8 = vpop.eup %1230 }
 0x750   :  { %v1233_v9 = vpop.eup %1232  ;;  %390 = vrot.lane.b32.xlu0 %v1231_v8, %s1317_s17 }
 0x751   :  { %392 = vrot.lane.b32.xlu1 %v1233_v9, %s1317_s17 }
 0x7c2   :  { %v391_v10 = vpop.permute.xlu0 %390 }
 0x7c3   :  { %v393_v12 = vpop.permute.xlu1 %392  ;;  %v1455_v13 = vmul.f32 %v1227_v54, %v391_v10 }
 0x7c4   :  { %v1457_v14 = vmul.f32 %v1229_v56, %v393_v12 }
 0x7c5   :  { %v409_v15 = vpack.c.bf16 %v1455_v13, %v1455_v13 }
 0x7c6   :  { %v410_v16 = vpack.c.bf16 %v1457_v14, %v1457_v14 }
 0x7c7   :  { %v413_v17 = vunpack.c.l.b16 %v409_v15 }
 0x7c8   :  { %v414_v18 = vunpack.c.l.b16 %v410_v16 }
 0x7c9   :  { %v415_v19 = vrot.slane %v413_v17, 2 }
 0x7ca   :  { %v416_v20 = vrot.slane %v414_v18, 1 }
 0x7cc   :  { %v417_v21 = vsel %vm164_vm3, %v416_v20, %v415_v19 }
 0x7cd   :  { %v418_v22 = vpack.c.b16 %v417_v21, %v417_v21 }
 0x7cf   :  { %419 = vrot.lane.b32.xlu0 %v418_v22, %s1316_s1 }
 0x841   :  { %v420_v23 = vpop.permute.xlu0 %419 }
 0x842   :  { %1144 = vmatmul.mubr.msk.bf16.vlgmr.msra.gmra.mxu1 %vm40_vm2, %v420_v23 }
 0x843   :  { %1156 = vmatpush3.bf16.msra.mxu1 %v1338_v1  ;;  %1159 = vmatprep.mubr.msk.bf16.mxu1 %vm1315_vm1, %v1314_v0 }
 0x844   :  { %1157 = vmatprep.subr.bf16.mxu1 %v1314_v0 }
 0x847   :  { %1158 = vmatpush3.bf16.msra.mxu1 %v1351_v2 }
 0x848   :  { %1171 = vmatprep.subr.bf16.mxu1 %v1314_v0 }
 0x902   :  { %v458_v24 = vpop.f32.mrf.mxu1 }
 0x903   :  { %v465_v26 = vrot.slane %v458_v24, 5  ;;  %v466_v28 = vrot.slane %v458_v24, 6 }
 0x904   :  { %v1145_v29 = vpop.f32.mrf.mxu1 }
 0x905   :  { %v469_v30 = vadd.f32 %v465_v26, %v1377_v11  ;;  %v470_v31 = vadd.f32 %v466_v28, %v1372_v7 }
 0x906   :  { %v461_v32 = vpop.f32.mrf.mxu1 }
 0x907   :  { %1234 = vtanh.f32 %v469_v30  ;;  %v1077_v36 = vmul.f32 -1.442695, %v469_v30  ;;  %v1078_v37 = vmul.f32 -1.442695, %v470_v31 }
 0x908   :  { %1236 = vtanh.f32 %v470_v31  ;;  %v1146_v33 = vpop.f32.mrf.mxu1 }
 0x909   :  { %1238 = vpow2.f32 %v1077_v36 }
 0x90a   :  { %1240 = vpow2.f32 %v1078_v37 }
 0x914   :  { %v1235_v34 = vpop.eup %1234 }
 0x915   :  { %v1237_v35 = vpop.eup %1236  ;;  %495 = vrot.lane.b32.xlu1 %v1235_v34, %s1317_s17 }
 0x916   :  { %497 = vrot.lane.b32.xlu0 %v1237_v35, %s1317_s17  ;;  %v1239_v38 = vpop.eup %1238 }
 0x917   :  { %v1241_v39 = vpop.eup %1240  ;;  %v477_v40 = vadd.f32 1.0, %v1239_v38 }
 0x918   :  { %v478_v42 = vadd.f32 1.0, %v1241_v39 }
 0x919   :  { %1242 = vrcp.f32 %v477_v40 }
 0x91a   :  { %1244 = vrcp.f32 %v478_v42 }
 0x926   :  { %v1243_v43 = vpop.eup %1242 }
 0x927   :  { %v1245_v46 = vpop.eup %1244  ;;  %v491_v52 = vmul.f32 %v1243_v43, %v487_v50 }
 0x928   :  { %v492_v53 = vmul.f32 %v1245_v46, %v488_v51 }
 0x987   :  { %v496_v44 = vpop.permute.xlu1 %495 }
 0x988   :  { %v498_v47 = vpop.permute.xlu0 %497  ;;  %v501_v48 = vmul.f32 %v1243_v43, %v496_v44 }
 0x989   :  { %v502_v49 = vmul.f32 %v1245_v46, %v498_v47 }
 0x98a   :  { %505 = vrot.lane.b32.xlu1 %v501_v48, %s1316_s1 }
 0x98b   :  { %507 = vrot.lane.b32.xlu0 %v502_v49, %s1316_s1 }
 0x9fc   :  { %v506_v54 = vpop.permute.xlu1 %505 }
 0x9fd   :  { %v508_v55 = vpop.permute.xlu0 %507  ;;  %v511_v56 = vadd.f32 %v506_v54, %v491_v52 }
 0x9fe   :  { %v512_v57 = vadd.f32 %v508_v55, %v492_v53 }
 0x9ff   :  { %1246 = vtanh.f32 %v511_v56  ;;  %v614_v40 = vrot.slane %v511_v56, 7 }
 0xa00   :  { %1248 = vtanh.f32 %v512_v57  ;;  %v615_v42 = vrot.slane %v512_v57, 7 }
 0xa0c   :  { %v1247_v58 = vpop.eup %1246 }
 0xa0d   :  { %v1249_v59 = vpop.eup %1248  ;;  %517 = vrot.lane.b32.xlu1 %v1247_v58, %s1317_s17 }
 0xa0e   :  { %519 = vrot.lane.b32.xlu0 %v1249_v59, %s1317_s17 }
 0xa7f   :  { %v518_v60 = vpop.permute.xlu1 %517 }
 0xa80   :  { %v520_v61 = vpop.permute.xlu0 %519  ;;  %v1482_v62 = vmul.f32 %v1243_v43, %v518_v60 }
 0xa81   :  { %v1484_v63 = vmul.f32 %v1245_v46, %v520_v61 }
 0xa82   :  { %v536_v3 = vpack.c.bf16 %v1482_v62, %v1482_v62 }
 0xa83   :  { %v537_v4 = vpack.c.bf16 %v1484_v63, %v1484_v63 }
 0xa84   :  { %v540_v5 = vunpack.c.l.b16 %v536_v3 }
 0xa85   :  { %v541_v6 = vunpack.c.l.b16 %v537_v4 }
 0xa86   :  { %v542_v8 = vrot.slane %v540_v5, 3 }
 0xa87   :  { %v543_v9 = vrot.slane %v541_v6, 2 }
 0xa89   :  { %v544_v10 = vsel %vm164_vm3, %v543_v9, %v542_v8 }
 0xa8a   :  { %v545_v12 = vpack.c.b16 %v544_v10, %v544_v10 }
 0xa8c   :  { %546 = vrot.lane.b32.xlu1 %v545_v12, %s1316_s1 }
 0xafe   :  { %v547_v15 = vpop.permute.xlu1 %546 }
 0xaff   :  { %1152 = vmatmul.mubr.msk.bf16.vlgmr.msra.gmra.mxu0 %vm40_vm2, %v547_v15 }
 0xb00   :  { %1164 = vmatpush3.bf16.msra.mxu0 %v1338_v1  ;;  %1167 = vmatprep.mubr.msk.bf16.mxu0 %vm1315_vm1, %v1314_v0 }
 0xb01   :  { %1165 = vmatprep.subr.bf16.mxu0 %v1314_v0 }
 0xb04   :  { %1166 = vmatpush3.bf16.msra.mxu0 %v1351_v2 }
 0xbbf   :  { %v585_v16 = vpop.f32.mrf.mxu0 }
 0xbc0   :  { %v592_v17 = vrot.slane %v585_v16, 4  ;;  %v593_v18 = vrot.slane %v585_v16, 5 }
 0xbc1   :  { %v1153_v19 = vpop.f32.mrf.mxu0 }
 0xbc2   :  { %v596_v20 = vadd.f32 %v592_v17, %v1377_v11  ;;  %v597_v21 = vadd.f32 %v593_v18, %v1372_v7 }
 0xbc3   :  { %v588_v22 = vpop.f32.mrf.mxu0 }
 0xbc4   :  { %1250 = vtanh.f32 %v596_v20  ;;  %v1080_v28 = vmul.f32 -1.442695, %v596_v20  ;;  %v1081_v29 = vmul.f32 -1.442695, %v597_v21 }
 0xbc5   :  { %1252 = vtanh.f32 %v597_v21  ;;  %v1154_v23 = vpop.f32.mrf.mxu0 }
 0xbc6   :  { %1254 = vpow2.f32 %v1080_v28 }
 0xbc7   :  { %1256 = vpow2.f32 %v1081_v29 }
 0xbd1   :  { %v1251_v24 = vpop.eup %1250 }
 0xbd2   :  { %v1253_v26 = vpop.eup %1252  ;;  %622 = vrot.lane.b32.xlu0 %v1251_v24, %s1317_s17 }
 0xbd3   :  { %624 = vrot.lane.b32.xlu1 %v1253_v26, %s1317_s17  ;;  %v1255_v30 = vpop.eup %1254 }
 0xbd4   :  { %v1257_v31 = vpop.eup %1256  ;;  %v604_v32 = vadd.f32 1.0, %v1255_v30 }
 0xbd5   :  { %v605_v33 = vadd.f32 1.0, %v1257_v31 }
 0xbd6   :  { %1258 = vrcp.f32 %v604_v32 }
 0xbd7   :  { %1260 = vrcp.f32 %v605_v33 }
 0xbe3   :  { %v1259_v34 = vpop.eup %1258 }
 0xbe4   :  { %v1261_v36 = vpop.eup %1260  ;;  %v618_v43 = vmul.f32 %v1259_v34, %v614_v40 }
 0xbe5   :  { %v619_v44 = vmul.f32 %v1261_v36, %v615_v42 }
 0xc44   :  { %v623_v35 = vpop.permute.xlu0 %622 }
 0xc45   :  { %v625_v37 = vpop.permute.xlu1 %624  ;;  %v628_v38 = vmul.f32 %v1259_v34, %v623_v35 }
 0xc46   :  { %v629_v39 = vmul.f32 %v1261_v36, %v625_v37 }
 0xc47   :  { %632 = vrot.lane.b32.xlu0 %v628_v38, %s1316_s1 }
 0xc48   :  { %634 = vrot.lane.b32.xlu1 %v629_v39, %s1316_s1 }
 0xcb9   :  { %v633_v46 = vpop.permute.xlu0 %632 }
 0xcba   :  { %v635_v47 = vpop.permute.xlu1 %634  ;;  %v638_v48 = vadd.f32 %v633_v46, %v618_v43 }
 0xcbb   :  { %v639_v49 = vadd.f32 %v635_v47, %v619_v44 }
 0xcbc   :  { %1262 = vtanh.f32 %v638_v48  ;;  %v741_v31 = vrot.slane %v638_v48, 7 }
 0xcbd   :  { %1264 = vtanh.f32 %v639_v49  ;;  %v742_v32 = vrot.slane %v639_v49, 7 }
 0xcc9   :  { %v1263_v50 = vpop.eup %1262 }
 0xcca   :  { %v1265_v51 = vpop.eup %1264  ;;  %644 = vrot.lane.b32.xlu0 %v1263_v50, %s1317_s17 }
 0xccb   :  { %646 = vrot.lane.b32.xlu1 %v1265_v51, %s1317_s17 }
 0xd3c   :  { %v645_v52 = vpop.permute.xlu0 %644 }
 0xd3d   :  { %v647_v53 = vpop.permute.xlu1 %646  ;;  %v1506_v54 = vmul.f32 %v1259_v34, %v645_v52 }
 0xd3e   :  { %v1508_v55 = vmul.f32 %v1261_v36, %v647_v53 }
 0xd3f   :  { %v663_v56 = vpack.c.bf16 %v1506_v54, %v1506_v54 }
 0xd40   :  { %v664_v57 = vpack.c.bf16 %v1508_v55, %v1508_v55 }
 0xd41   :  { %v667_v58 = vunpack.c.l.b16 %v663_v56 }
 0xd42   :  { %v668_v59 = vunpack.c.l.b16 %v664_v57 }
 0xd43   :  { %v669_v60 = vrot.slane %v667_v58, 4 }
 0xd44   :  { %v670_v61 = vrot.slane %v668_v59, 3 }
 0xd46   :  { %v671_v3 = vsel %vm164_vm3, %v670_v61, %v669_v60 }
 0xd47   :  { %v672_v4 = vpack.c.b16 %v671_v3, %v671_v3 }
 0xd49   :  { %673 = vrot.lane.b32.xlu0 %v672_v4, %s1316_s1 }
 0xdbb   :  { %v674_v5 = vpop.permute.xlu0 %673 }
 0xdbc   :  { %1160 = vmatmul.mubr.msk.bf16.vlgmr.msra.gmra.mxu1 %vm40_vm2, %v674_v5 }
 0xdbd   :  { %1172 = vmatpush3.bf16.msra.mxu1 %v1338_v1  ;;  %1175 = vmatprep.mubr.msk.bf16.mxu1 %vm1315_vm1, %v1314_v0 }
 0xdbe   :  { %1173 = vmatprep.subr.bf16.mxu1 %v1314_v0 }
 0xdc1   :  { %1174 = vmatpush3.bf16.msra.mxu1 %v1351_v2 }
 0xe7c   :  { %v712_v6 = vpop.f32.mrf.mxu1 }
 0xe7d   :  { %v719_v8 = vrot.slane %v712_v6, 3  ;;  %v720_v9 = vrot.slane %v712_v6, 4 }
 0xe7e   :  { %v1161_v10 = vpop.f32.mrf.mxu1 }
 0xe7f   :  { %v723_v12 = vadd.f32 %v719_v8, %v1377_v11  ;;  %v724_v15 = vadd.f32 %v720_v9, %v1372_v7 }
 0xe80   :  { %v715_v16 = vpop.f32.mrf.mxu1 }
 0xe81   :  { %1266 = vtanh.f32 %v723_v12  ;;  %v1083_v0 = vmul.f32 -1.442695, %v723_v12  ;;  %v1084_v2 = vmul.f32 -1.442695, %v724_v15 }
 0xe82   :  { %1268 = vtanh.f32 %v724_v15  ;;  %v1162_v17 = vpop.f32.mrf.mxu1 }
 0xe83   :  { %1270 = vpow2.f32 %v1083_v0 }
 0xe84   :  { %1272 = vpow2.f32 %v1084_v2 }
 0xe8e   :  { %v1267_v1 = vpop.eup %1266 }
 0xe8f   :  { %v1269_v18 = vpop.eup %1268  ;;  %749 = vrot.lane.b32.xlu1 %v1267_v1, %s1317_s17 }
 0xe90   :  { %751 = vrot.lane.b32.xlu0 %v1269_v18, %s1317_s17  ;;  %v1271_v19 = vpop.eup %1270 }
 0xe91   :  { %v1273_v20 = vpop.eup %1272  ;;  %v731_v21 = vadd.f32 1.0, %v1271_v19 }
 0xe92   :  { %v732_v22 = vadd.f32 1.0, %v1273_v20 }
 0xe93   :  { %1274 = vrcp.f32 %v731_v21 }
 0xe94   :  { %1276 = vrcp.f32 %v732_v22 }
 0xea0   :  { %v1275_v23 = vpop.eup %1274 }
 0xea1   :  { %v1277_v26 = vpop.eup %1276  ;;  %v745_v33 = vmul.f32 %v1275_v23, %v741_v31 }
 0xea2   :  { %v746_v34 = vmul.f32 %v1277_v26, %v742_v32 }
 0xf01   :  { %v750_v24 = vpop.permute.xlu1 %749 }
 0xf02   :  { %v752_v28 = vpop.permute.xlu0 %751  ;;  %v755_v29 = vmul.f32 %v1275_v23, %v750_v24 }
 0xf03   :  { %v756_v30 = vmul.f32 %v1277_v26, %v752_v28 }
 0xf04   :  { %759 = vrot.lane.b32.xlu1 %v755_v29, %s1316_s1 }
 0xf05   :  { %761 = vrot.lane.b32.xlu0 %v756_v30, %s1316_s1 }
 0xf76   :  { %v760_v35 = vpop.permute.xlu1 %759 }
 0xf77   :  { %v762_v36 = vpop.permute.xlu0 %761  ;;  %v765_v37 = vadd.f32 %v760_v35, %v745_v33 }
 0xf78   :  { %v766_v38 = vadd.f32 %v762_v36, %v746_v34 }
 0xf79   :  { %1278 = vtanh.f32 %v765_v37  ;;  %v868_v22 = vrot.slane %v765_v37, 7 }
 0xf7a   :  { %1280 = vtanh.f32 %v766_v38 }
 0xf86   :  { %v1279_v39 = vpop.eup %1278 }
 0xf87   :  { %v1281_v40 = vpop.eup %1280  ;;  %771 = vrot.lane.b32.xlu1 %v1279_v39, %s1317_s17 }
 0xf88   :  { %773 = vrot.lane.b32.xlu0 %v1281_v40, %s1317_s17 }
 0xff9   :  { %v772_v42 = vpop.permute.xlu1 %771 }
 0xffa   :  { %v774_v43 = vpop.permute.xlu0 %773  ;;  %v1530_v44 = vmul.f32 %v1275_v23, %v772_v42  ;;  %v869_v23 = vrot.slane %v766_v38, 7 }
 0xffb   :  { %v1532_v46 = vmul.f32 %v1277_v26, %v774_v43 }
 0xffc   :  { %v790_v47 = vpack.c.bf16 %v1530_v44, %v1530_v44 }
 0xffd   :  { %v791_v48 = vpack.c.bf16 %v1532_v46, %v1532_v46 }
 0xffe   :  { %v794_v49 = vunpack.c.l.b16 %v790_v47 }
 0xfff   :  { %v795_v50 = vunpack.c.l.b16 %v791_v48 }
0x1000   :  { %v796_v51 = vrot.slane %v794_v49, 5 }
0x1001   :  { %v797_v52 = vrot.slane %v795_v50, 4 }
0x1003   :  { %v798_v53 = vsel %vm164_vm3, %v797_v52, %v796_v51 }
0x1004   :  { %v799_v56 = vpack.c.b16 %v798_v53, %v798_v53 }
0x1006   :  { %800 = vrot.lane.b32.xlu1 %v799_v56, %s1316_s1 }
0x1078   :  { %v801_v57 = vpop.permute.xlu1 %800 }
0x1079   :  { %1168 = vmatmul.mubr.msk.bf16.vlgmr.msra.gmra.mxu0 %vm40_vm2, %v801_v57 }
0x1139   :  { %v839_v58 = vpop.f32.mrf.mxu0 }
0x113a   :  { %v846_v59 = vrot.slane %v839_v58, 2  ;;  %v847_v60 = vrot.slane %v839_v58, 3 }
0x113b   :  { %v1169_v61 = vpop.f32.mrf.mxu0 }
0x113c   :  { %v850_v3 = vadd.f32 %v846_v59, %v1377_v11  ;;  %v851_v4 = vadd.f32 %v847_v60, %v1372_v7 }
0x113d   :  { %v842_v5 = vpop.f32.mrf.mxu0 }
0x113e   :  { %1282 = vtanh.f32 %v850_v3  ;;  %v1086_v10 = vmul.f32 -1.442695, %v850_v3  ;;  %v1087_v12 = vmul.f32 -1.442695, %v851_v4 }
0x113f   :  { %1284 = vtanh.f32 %v851_v4  ;;  %v1170_v6 = vpop.f32.mrf.mxu0 }
0x1140   :  { %1286 = vpow2.f32 %v1086_v10 }
0x1141   :  { %1288 = vpow2.f32 %v1087_v12 }
0x114b   :  { %v1283_v8 = vpop.eup %1282 }
0x114c   :  { %v1285_v9 = vpop.eup %1284  ;;  %876 = vrot.lane.b32.xlu0 %v1283_v8, %s1317_s17 }
0x114d   :  { %878 = vrot.lane.b32.xlu1 %v1285_v9, %s1317_s17  ;;  %v1287_v15 = vpop.eup %1286 }
0x114e   :  { %v1289_v16 = vpop.eup %1288  ;;  %v858_v17 = vadd.f32 1.0, %v1287_v15 }
0x114f   :  { %v859_v1 = vadd.f32 1.0, %v1289_v16 }
0x1150   :  { %1290 = vrcp.f32 %v858_v17 }
0x1151   :  { %1292 = vrcp.f32 %v859_v1 }
0x115d   :  { %v1291_v18 = vpop.eup %1290 }
0x115e   :  { %v1293_v2 = vpop.eup %1292  ;;  %v872_v24 = vmul.f32 %v1291_v18, %v868_v22 }
0x115f   :  { %v873_v26 = vmul.f32 %v1293_v2, %v869_v23 }
0x11be   :  { %v877_v0 = vpop.permute.xlu0 %876 }
0x11bf   :  { %v879_v19 = vpop.permute.xlu1 %878  ;;  %v882_v20 = vmul.f32 %v1291_v18, %v877_v0 }
0x11c0   :  { %v883_v21 = vmul.f32 %v1293_v2, %v879_v19 }
0x11c1   :  { %886 = vrot.lane.b32.xlu0 %v882_v20, %s1316_s1 }
0x11c2   :  { %888 = vrot.lane.b32.xlu1 %v883_v21, %s1316_s1 }
0x1233   :  { %v887_v28 = vpop.permute.xlu0 %886 }
0x1234   :  { %v889_v29 = vpop.permute.xlu1 %888  ;;  %v892_v30 = vadd.f32 %v887_v28, %v872_v24 }
0x1235   :  { %v893_v31 = vadd.f32 %v889_v29, %v873_v26 }
0x1236   :  { %1294 = vtanh.f32 %v892_v30  ;;  %v995_v1 = vrot.slane %v892_v30, 7 }
0x1237   :  { %1296 = vtanh.f32 %v893_v31 }
0x1243   :  { %v1295_v32 = vpop.eup %1294 }
0x1244   :  { %v1297_v33 = vpop.eup %1296  ;;  %898 = vrot.lane.b32.xlu0 %v1295_v32, %s1317_s17 }
0x1245   :  { %900 = vrot.lane.b32.xlu1 %v1297_v33, %s1317_s17 }
0x12b6   :  { %v899_v34 = vpop.permute.xlu0 %898 }
0x12b7   :  { %v901_v35 = vpop.permute.xlu1 %900  ;;  %v1549_v36 = vmul.f32 %v1291_v18, %v899_v34  ;;  %v996_v18 = vrot.slane %v893_v31, 7 }
0x12b8   :  { %v1551_v37 = vmul.f32 %v1293_v2, %v901_v35 }
0x12b9   :  { %v917_v38 = vpack.c.bf16 %v1549_v36, %v1549_v36 }
0x12ba   :  { %v918_v39 = vpack.c.bf16 %v1551_v37, %v1551_v37 }
0x12bb   :  { %v921_v40 = vunpack.c.l.b16 %v917_v38 }
0x12bc   :  { %v922_v42 = vunpack.c.l.b16 %v918_v39 }
0x12bd   :  { %v923_v43 = vrot.slane %v921_v40, 6 }
0x12be   :  { %v924_v47 = vrot.slane %v922_v42, 5 }
0x12c0   :  { %v925_v48 = vsel %vm164_vm3, %v924_v47, %v923_v43 }
0x12c1   :  { %v926_v49 = vpack.c.b16 %v925_v48, %v925_v48 }
0x12c3   :  { %927 = vrot.lane.b32.xlu0 %v926_v49, %s1316_s1 }
0x1335   :  { %v928_v50 = vpop.permute.xlu0 %927 }
0x1336   :  { %1176 = vmatmul.mubr.msk.bf16.vlgmr.msra.gmra.mxu1 %vm40_vm2, %v928_v50 }
0x13f6   :  { %v966_v51 = vpop.f32.mrf.mxu1 }
0x13f7   :  { %v973_v52 = vrot.slane %v966_v51, 1  ;;  %v974_v53 = vrot.slane %v966_v51, 2 }
0x13f8   :  { %v1177_v56 = vpop.f32.mrf.mxu1 }
0x13f9   :  { %v977_v57 = vadd.f32 %v973_v52, %v1377_v11  ;;  %v978_v58 = vadd.f32 %v974_v53, %v1372_v7 }
0x13fa   :  { %v969_v59 = vpop.f32.mrf.mxu1 }
0x13fb   :  { %1298 = vtanh.f32 %v977_v57  ;;  %v1089_v4 = vmul.f32 -1.442695, %v977_v57  ;;  %v1090_v5 = vmul.f32 -1.442695, %v978_v58 }
0x13fc   :  { %1300 = vtanh.f32 %v978_v58  ;;  %v1178_v60 = vpop.f32.mrf.mxu1 }
0x13fd   :  { %1302 = vpow2.f32 %v1089_v4 }
0x13fe   :  { %1304 = vpow2.f32 %v1090_v5 }
0x1408   :  { %v1299_v61 = vpop.eup %1298 }
0x1409   :  { %v1301_v3 = vpop.eup %1300  ;;  %1003 = vrot.lane.b32.xlu0 %v1299_v61, %s1317_s17 }
0x140a   :  { %1005 = vrot.lane.b32.xlu1 %v1301_v3, %s1317_s17  ;;  %v1303_v6 = vpop.eup %1302 }
0x140b   :  { %v1305_v8 = vpop.eup %1304  ;;  %v985_v9 = vadd.f32 1.0, %v1303_v6 }
0x140c   :  { %v986_v11 = vadd.f32 1.0, %v1305_v8 }
0x140d   :  { %1306 = vrcp.f32 %v985_v9 }
0x140e   :  { %1308 = vrcp.f32 %v986_v11 }
0x141a   :  { %v1307_v7 = vpop.eup %1306 }
0x141b   :  { %v1309_v12 = vpop.eup %1308  ;;  %v999_v0 = vmul.f32 %v1307_v7, %v995_v1 }
0x141c   :  { %v1000_v2 = vmul.f32 %v1309_v12, %v996_v18 }
0x147b   :  { %v1004_v10 = vpop.permute.xlu0 %1003 }
0x147c   :  { %v1006_v15 = vpop.permute.xlu1 %1005  ;;  %v1009_v16 = vmul.f32 %v1307_v7, %v1004_v10 }
0x147d   :  { %v1010_v17 = vmul.f32 %v1309_v12, %v1006_v15 }
0x147e   :  { %1013 = vrot.lane.b32.xlu0 %v1009_v16, %s1316_s1 }
0x147f   :  { %1015 = vrot.lane.b32.xlu1 %v1010_v17, %s1316_s1 }
0x14f0   :  { %v1014_v19 = vpop.permute.xlu0 %1013 }
0x14f1   :  { %v1016_v20 = vpop.permute.xlu1 %1015  ;;  %v1019_v21 = vadd.f32 %v1014_v19, %v999_v0 }
0x14f2   :  { %v1020_v22 = vadd.f32 %v1016_v20, %v1000_v2 }
0x14f3   :  { %1310 = vtanh.f32 %v1019_v21 }
0x14f4   :  { %1312 = vtanh.f32 %v1020_v22 }
0x1500   :  { %v1311_v23 = vpop.eup %1310 }
0x1501   :  { %v1313_v24 = vpop.eup %1312  ;;  %1025 = vrot.lane.b32.xlu0 %v1311_v23, %s1317_s17 }
0x1502   :  { %1027 = vrot.lane.b32.xlu1 %v1313_v24, %s1317_s17 }
0x1505   :  { %150 = vrot.lane.b32.xlu0 %v1393_v41, %s1316_s1 }
0x1506   :  { %148 = vrot.lane.b32.xlu1 %v1397_v45, %s1316_s1 }
0x1509   :  { %276 = vrot.lane.b32.xlu0 %v1423_v25, %s1316_s1 }
0x150a   :  { %274 = vrot.lane.b32.xlu1 %v1425_v27, %s1316_s1 }
0x150d   :  { %402 = vrot.lane.b32.xlu0 %v1457_v14, %s1316_s1 }
0x150e   :  { %400 = vrot.lane.b32.xlu1 %v1455_v13, %s1316_s1 }
0x1511   :  { %529 = vrot.lane.b32.xlu0 %v1484_v63, %s1316_s1 }
0x1512   :  { %527 = vrot.lane.b32.xlu1 %v1482_v62, %s1316_s1 }
0x1515   :  { %656 = vrot.lane.b32.xlu0 %v1508_v55, %s1316_s1 }
0x1516   :  { %654 = vrot.lane.b32.xlu1 %v1506_v54, %s1316_s1  ;;  %v1052_v54 = vrot.slane %v1020_v22, 7 }
0x1519   :  { %783 = vrot.lane.b32.xlu0 %v1532_v46, %s1316_s1 }
0x151a   :  { %781 = vrot.lane.b32.xlu1 %v1530_v44, %s1316_s1 }
0x151d   :  { %910 = vrot.lane.b32.xlu0 %v1551_v37, %s1316_s1 }
0x151e   :  { %908 = vrot.lane.b32.xlu1 %v1549_v36, %s1316_s1 }
0x1573   :  { %v1026_v41 = vpop.permute.xlu0 %1025 }
0x1574   :  { %v1028_v45 = vpop.permute.xlu1 %1027  ;;  %v1031_v25 = vmul.f32 %v1307_v7, %v1026_v41 }
0x1575   :  { %v1032_v27 = vmul.f32 %v1309_v12, %v1028_v45 }
0x1576   :  { %1035 = vrot.lane.b32.xlu1 %v1031_v25, %s1316_s1 }
0x1577   :  { %1037 = vrot.lane.b32.xlu0 %v1032_v27, %s1316_s1  ;;  %v151_v13 = vpop.permute.xlu0 %150  ;;  %v1044_v14 = vrot.slane %v1032_v27, 7 }
0x1578   :  { %v149_v62 = vpop.permute.xlu1 %148  ;;  %156 = vst.msk [vmem:[%s1653_s2 + $0x8] sm:$0x1] %vm154_vm4, %v151_v13 }
0x1579   :  { %155 = vst.msk [vmem:[%s1653_s2] sm:$0x1] %vm154_vm4, %v149_v62 }
0x157a   :  { %1045 = vrot.lane.b32.xlu1 %v1044_v14, %s1316_s1 }
0x157b   :  { %1053 = vrot.lane.b32.xlu0 %v1019_v21, %s1318_s21  ;;  %v277_v63 = vpop.permute.xlu0 %276 }
0x157c   :  { %v275_v55 = vpop.permute.xlu1 %274  ;;  %282 = vst.msk [vmem:[%s1653_s2 + $0x8] sm:$0x2] %vm280_vm5, %v277_v63 }
0x157d   :  { %281 = vst.msk [vmem:[%s1653_s2] sm:$0x2] %vm280_vm5, %v275_v55 }
0x157e   :  { %1055 = vrot.lane.b32.xlu1 %v1052_v54, %s1318_s21 }
0x157f   :  { %v403_v44 = vpop.permute.xlu0 %402 }
0x1580   :  { %v401_v46 = vpop.permute.xlu1 %400  ;;  %408 = vst.msk [vmem:[%s1653_s2 + $0x8] sm:$0x4] %vm406_vm6, %v403_v44 }
0x1581   :  { %407 = vst.msk [vmem:[%s1653_s2] sm:$0x4] %vm406_vm6, %v401_v46 }
0x1583   :  { %v530_v26 = vpop.permute.xlu0 %529 }
0x1584   :  { %v528_v28 = vpop.permute.xlu1 %527  ;;  %535 = vst.msk [vmem:[%s1653_s2 + $0x8] sm:$0x8] %vm533_vm7, %v530_v26 }
0x1585   :  { %534 = vst.msk [vmem:[%s1653_s2] sm:$0x8] %vm533_vm7, %v528_v28 }
0x1587   :  { %v657_v29 = vpop.permute.xlu0 %656 }
0x1588   :  { %v655_v30 = vpop.permute.xlu1 %654  ;;  %662 = vst.msk [vmem:[%s1653_s2 + $0x8] sm:$0x10] %vm660_vm8, %v657_v29 }
0x1589   :  { %661 = vst.msk [vmem:[%s1653_s2] sm:$0x10] %vm660_vm8, %v655_v30 }
0x158b   :  { %v784_v31 = vpop.permute.xlu0 %783 }
0x158c   :  { %v782_v32 = vpop.permute.xlu1 %781  ;;  %789 = vst.msk [vmem:[%s1653_s2 + $0x8] sm:$0x20] %vm787_vm9, %v784_v31 }
0x158d   :  { %788 = vst.msk [vmem:[%s1653_s2] sm:$0x20] %vm787_vm9, %v782_v32 }
0x158f   :  { %v911_v33 = vpop.permute.xlu0 %910 }
0x1590   :  { %v909_v34 = vpop.permute.xlu1 %908  ;;  %916 = vst.msk [vmem:[%s1653_s2 + $0x8] sm:$0x40] %vm914_vm10, %v911_v33 }
0x1591   :  { %915 = vst.msk [vmem:[%s1653_s2] sm:$0x40] %vm914_vm10, %v909_v34 }
0x15e8   :  { %v1036_v35 = vpop.permute.xlu1 %1035 }
0x15e9   :  { %1042 = vst.msk [vmem:[%s1653_s2] sm:$0x80] %vm1041_vm11, %v1036_v35  ;;  %1048 = vst.msk [vmem:[#allocation2 - $0x7] sm:$0x80] %vm1041_vm11, %v1036_v35  ;;  %v1038_v36 = vpop.permute.xlu0 %1037 }
0x15ea   :  { %1043 = vst.msk [vmem:[%s1653_s2 + $0x8] sm:$0x80] %vm1041_vm11, %v1038_v36 }
0x15ec   :  { %v1046_v37 = vpop.permute.xlu1 %1045 }
0x15ed   :  { %1049 = vst.msk [vmem:[#allocation2 + $0x1] sm:$0x1] %vm154_vm4, %v1046_v37  ;;  %v1054_v38 = vpop.permute.xlu0 %1053 }
0x15ee   :  { %1059 = vst.msk [vmem:[#allocation3 - $0x7] sm:$0x80] %vm1041_vm11, %v1054_v38 }
0x15f0   :  { %v1056_v39 = vpop.permute.xlu1 %1055 }
0x15f1   :  { %1060 = vst.msk [vmem:[#allocation3 + $0x1] sm:$0x1] %vm154_vm4, %v1056_v39 }

</bundles_post_ra>
